<compile_context>
chip_gen: v6e
topology: v6e:2x2x1
jax: 0.10.0
libtpu: 0.0.40
codegen_flags: <defaults>
</compile_context>

<pallas_src>
import jax
import jax.numpy as jnp
import numpy as np
from jax import lax
from jax.experimental import pallas as pl
from jax.experimental.pallas import tpu as pltpu

_HP = jax.lax.Precision.HIGHEST


# --------------------------- VMEM / tile planning ----------------------------------
def _vmem_capacity_bytes():
    try:
        info = pltpu.get_tpu_info()
        cap = getattr(info, "vmem_capacity_bytes", None)
        if cap:
            return int(cap)
    except Exception:
        pass
    return 64 * 1024 * 1024            # conservative floor (v7x per-TensorCore VMEM)


def _plan_tiles(n_frames, nf, hw):
    """Pick the spatial chunk ts and an explicit scoped-VMEM limit.

    Per-lane footprint (bytes) accounts for: double-buffered x block, pass-2's
    double-buffered output block, and ~(N+4) live (C, ts) f32 temporaries that
    Mosaic materializes in VMEM (xs slices + d2t/e2t/zc + matmul operands)."""
    cap = _vmem_capacity_bytes()
    per_lane = (2 * n_frames * nf + 2 * n_frames * nf + (n_frames + 4) * nf) * 4
    budget = int(cap * 0.55)           # leave headroom for Mosaic internals / sems
    if hw <= 128:
        ts = hw                        # single full-extent block (allowed: equals dim)
    else:
        ts = min(budget // per_lane, hw, 32 * 1024)
        ts = max(128, (ts // 128) * 128)
    n_chunks = -(-hw // ts)
    ragged = (hw % ts) != 0
    need = per_lane * ts + (4 << 20)
    vmem_limit = int(min(cap * 0.9, max(need, 32 << 20)))
    return ts, n_chunks, ragged, vmem_limit


# --------------- pass 1: per-batch Gram / row-sum statistics (partial) --------------
def _make_gram_kernel(n_frames, hw, ts, chunks_per_split, ragged):
    def kernel(x_ref, wA2T_ref, wB2T_ref, gt_ref, s_ref, r_ref):
        c_idx = pl.program_id(2)

        @pl.when(c_idx == 0)
        def _init():
            gt_ref[...] = jnp.zeros_like(gt_ref)
            s_ref[...] = jnp.zeros_like(s_ref)
            r_ref[...] = jnp.zeros_like(r_ref)

        xb = x_ref[...].astype(jnp.float32)              # (N, C, ts)
        if ragged:
            # mask out-of-range spatial columns (jnp.where so padding NaN/Inf is safe)
            s_idx = pl.program_id(1)
            base = (s_idx * chunks_per_split + c_idx) * ts
            col = lax.broadcasted_iota(jnp.int32, (1, 1, ts), 2) + base
            xb = jnp.where(col < hw, xb, 0.0)

        xs = [xb[n] for n in range(n_frames)]            # each (C, ts)
        dn = (((1,), (1,)), ((), ()))                    # contract both over lanes

        gt_sum = None
        s_sum = None
        for n in range(n_frames):
            # channel self-Gram (big-K MXU); channel convs folded into the epilogue
            p = lax.dot_general(xs[n], xs[n], dn, precision=_HP,
                                preferred_element_type=jnp.float32)
            s_sum = p if s_sum is None else s_sum + p
            # bias-free frame-mixing convs: unrolled VPU broadcast FMAs
            a2t = xs[0] * wA2T_ref[n, 0]
            b2t = xs[0] * wB2T_ref[n, 0]
            for m in range(1, n_frames):
                a2t = a2t + xs[m] * wA2T_ref[n, m]
                b2t = b2t + xs[m] * wB2T_ref[n, m]
            g = lax.dot_general(a2t, b2t, dn, precision=_HP,
                                preferred_element_type=jnp.float32)
            gt_sum = g if gt_sum is None else gt_sum + g

        gt_ref[0] += gt_sum                              # (C, C)
        s_ref[0] += s_sum                                # (C, C)
        r_ref[0] += jnp.sum(xb, axis=-1)                 # (N, C) per-frame row sums
    return kernel


# ------------- pass 2: fused attention apply + folded D convs + residual ------------
def _make_apply_kernel(n_frames):
    def kernel(x_ref, m2t_ref, wc_ref, bv_ref, wD2T_ref, bD2T_ref, o_ref):
        m2t = m2t_ref[0]                                 # (C, C)
        wc = wc_ref[0]                                   # (C, C) = M2C @ wD2C + I
        bv = bv_ref[0]                                   # (C, 1) = M2C @ bD2C
        xs = [x_ref[n].astype(jnp.float32) for n in range(n_frames)]
        for n in range(n_frames):
            d2t = xs[0] * wD2T_ref[n, 0]                 # frame mix (no bias needed:
            for m in range(1, n_frames):                 #  softmax rows sum to 1)
                d2t = d2t + xs[m] * wD2T_ref[n, m]
            e2t = jnp.dot(m2t, d2t, precision=_HP, preferred_element_type=jnp.float32)
            zc = jnp.dot(wc, xs[n], precision=_HP, preferred_element_type=jnp.float32)
            o_ref[n] = (e2t + zc + bv + bD2T_ref[n]).astype(o_ref.dtype)
    return kernel


# ------------------------------------ wrapper --------------------------------------
def separable_nl_channel(x, params):
    """x: (B, N, C, H, W) float32. params: the 6 (w, b) conv pairs + scale."""
    (wA2T, bA2T, wA2C, bA2C,
     wB2T, bB2T, wB2C, bB2C,
     wD2T, bD2T, wD2C, bD2C, scale) = params

    B, N, C, H, W = x.shape
    HW = H * W
    f32 = jnp.float32
    x3 = x.reshape(B * N, C, HW)                         # free reshape, no transpose

    ts, n_chunks, ragged, vmem_limit = _plan_tiles(N, C, HW)
    # v7x megacore coverage when B is small: split the HW reduction across 2 cores.
    split = 2 if (B == 1 and n_chunks >= 2 and n_chunks % 2 == 0) else 1
    chunks_per = n_chunks // split

    smem = pl.BlockSpec(memory_space=pltpu.MemorySpace.SMEM)

    # ---------------- pass 1: partial GT / S / R statistics ------------------------
    x_spec1 = pl.BlockSpec((N, C, ts), lambda b, s, c: (b, 0, s * chunks_per + c))
    gcc_spec = pl.BlockSpec((1, C, C), lambda b, s, c: (b * split + s, 0, 0))
    r_spec = pl.BlockSpec((1, N, C), lambda b, s, c: (b * split + s, 0, 0))

    cost1 = pl.CostEstimate(
        flops=int(B * HW * (4 * N * C * C + 4 * N * N * C + N * C)),
        transcendentals=0,
        bytes_accessed=int(4 * (B * N * C * HW + B * split * (2 * C * C + N * C))))

    gt_p, s_p, r_p = pl.pallas_call(
        _make_gram_kernel(N, HW, ts, chunks_per, ragged),
        out_shape=(jax.ShapeDtypeStruct((B * split, C, C), f32),
                   jax.ShapeDtypeStruct((B * split, C, C), f32),
                   jax.ShapeDtypeStruct((B * split, N, C), f32)),
        grid_spec=pltpu.PrefetchScalarGridSpec(
            num_scalar_prefetch=0,
            grid=(B, split, chunks_per),
            in_specs=[x_spec1, smem, smem],
            out_specs=(gcc_spec, gcc_spec, r_spec)),
        compiler_params=pltpu.CompilerParams(
            dimension_semantics=("parallel", "parallel", "arbitrary"),
            vmem_limit_bytes=vmem_limit),
        cost_estimate=cost1,
    )(x3, wA2T, wB2T)

    # ------------- tiny per-batch epilogue in plain JAX ((B,C,C) math) -------------
    GT = gt_p.reshape(B, split, C, C).sum(axis=1)
    S = s_p.reshape(B, split, C, C).sum(axis=1)
    R = r_p.reshape(B, split, N, C).sum(axis=1)          # (B, N, C)
    r_tot = R.sum(axis=1)                                # (B, C)

    # G2T = GT + rank-1 bias cross terms + constant
    tA = jnp.einsum('n,nm,bmc->bc', bB2T, wA2T, R, precision=_HP)
    tB = jnp.einsum('n,np,bpd->bd', bA2T, wB2T, R, precision=_HP)
    g2t = GT + tA[:, :, None] + tB[:, None, :] + HW * jnp.dot(bA2T, bB2T, precision=_HP)

    # G2C = wA2C S wB2C^T + rank-1 bias terms + constant
    u = jnp.einsum('ik,bk->bi', wA2C, r_tot, precision=_HP)
    v = jnp.einsum('jl,bl->bj', wB2C, r_tot, precision=_HP)
    g2c = (jnp.einsum('ik,bkl,jl->bij', wA2C, S, wB2C, precision=_HP)
           + u[:, :, None] * bB2C[None, None, :]
           + bA2C[None, :, None] * v[:, None, :]
           + (N * HW) * (bA2C[:, None] * bB2C[None, :])[None])

    sc = jnp.asarray(scale, f32).reshape(())
    m2t = jax.nn.softmax(g2t / sc, axis=-1)              # (B, C, C)
    m2c = jax.nn.softmax(g2c / sc, axis=-1)

    # pass-2 algebraic folds: channel path + residual and its bias
    wc_eff = (jnp.einsum('bij,jk->bik', m2c, wD2C, precision=_HP)
              + jnp.eye(C, dtype=f32)[None])             # (B, C, C)
    bvec = jnp.einsum('bij,j->bi', m2c, bD2C, precision=_HP).reshape(B, C, 1)

    # --------------- pass 2: apply attention + residual, native layout --------------
    x_spec2 = pl.BlockSpec((N, C, ts), lambda b, c: (b, 0, c))
    m_spec2 = pl.BlockSpec((1, C, C), lambda b, c: (b, 0, 0))
    bv_spec = pl.BlockSpec((1, C, 1), lambda b, c: (b, 0, 0))

    cost2 = pl.CostEstimate(
        flops=int(B * HW * (4 * N * C * C + 2 * N * N * C + 3 * N * C)),
        transcendentals=0,
        bytes_accessed=int(4 * 2 * B * N * C * HW))

    out3 = pl.pallas_call(
        _make_apply_kernel(N),
        out_shape=jax.ShapeDtypeStruct((B * N, C, HW), x.dtype),
        grid_spec=pltpu.PrefetchScalarGridSpec(
            num_scalar_prefetch=0,
            grid=(B, n_chunks),
            in_specs=[x_spec2, m_spec2, m_spec2, bv_spec, smem, smem],
            out_specs=x_spec2),
        compiler_params=pltpu.CompilerParams(
            dimension_semantics=("parallel", "parallel"),
            vmem_limit_bytes=vmem_limit),
        cost_estimate=cost2,
    )(x3, m2t, wc_eff, bvec, wD2T, bD2T)

    return out3.reshape(B, N, C, H, W)


# ------------------------------ pure-JAX reference ---------------------------------
def _reference(x, params):
    (wA2T, bA2T, wA2C, bA2C,
     wB2T, bB2T, wB2C, bB2C,
     wD2T, bD2T, wD2C, bD2C, scale) = params
    B, N, C, H, W = x.shape

    def conv1(t, w, b):   # 1x1x1 Conv3d mixing over axis 1
        return (jnp.einsum('ij,bjklm->biklm', w, t, precision=_HP)
                + b[None, :, None, None, None])

    x_p = jnp.transpose(x, (0, 2, 1, 3, 4))                       # (B, C, N, H, W)
    A2T = jnp.transpose(conv1(x, wA2T, bA2T), (0, 2, 1, 3, 4)).reshape(B, C, N * H * W)
    A2C = conv1(x_p, wA2C, bA2C).reshape(B, C, N * H * W)
    B2T = jnp.transpose(conv1(x, wB2T, bB2T), (0, 1, 3, 4, 2)).reshape(B, N * H * W, C)
    B2C = jnp.transpose(jnp.transpose(conv1(x_p, wB2C, bB2C), (0, 2, 1, 3, 4)),
                        (0, 1, 3, 4, 2)).reshape(B, N * H * W, C)
    D2T = jnp.transpose(conv1(x, wD2T, bD2T), (0, 2, 1, 3, 4)).reshape(B, C, N * H * W)
    D2C = conv1(x_p, wD2C, bD2C).reshape(B, C, N * H * W)

    M2T = jax.nn.softmax(jnp.matmul(A2T, B2T, precision=_HP) / scale, axis=-1)
    M2C = jax.nn.softmax(jnp.matmul(A2C, B2C, precision=_HP) / scale, axis=-1)
    E2T = jnp.transpose(jnp.matmul(M2T, D2T, precision=_HP).reshape(B, C, N, H, W),
                        (0, 2, 1, 3, 4))
    E2C = jnp.transpose(jnp.matmul(M2C, D2C, precision=_HP).reshape(B, C, N, H, W),
                        (0, 2, 1, 3, 4))
    return E2C + E2T + x


# -------------------------------------- main ---------------------------------------
if __name__ == "__main__":
    B, num_frames, nf, H, W = 2, 4, 8, 16, 16       # x: (B, N, C, H, W)

    key = jax.random.PRNGKey(0)
    keys = jax.random.split(key, 13)

    x = jax.random.normal(keys[0], (B, num_frames, nf, H, W), dtype=jnp.float32)

    def conv_params(kw, kb, cin):                    # PyTorch Conv3d default init
        k = 1.0 / np.sqrt(cin)
        w = jax.random.uniform(kw, (cin, cin), jnp.float32, -k, k)
        b = jax.random.uniform(kb, (cin,), jnp.float32, -k, k)
        return w, b

    wA2T, bA2T = conv_params(keys[1], keys[2], num_frames)
    wA2C, bA2C = conv_params(keys[3], keys[4], nf)
    wB2T, bB2T = conv_params(keys[5], keys[6], num_frames)
    wB2C, bB2C = conv_params(keys[7], keys[8], nf)
    wD2T, bD2T = conv_params(keys[9], keys[10], num_frames)
    wD2C, bD2C = conv_params(keys[11], keys[12], nf)
    scale = jnp.full((1, 1), np.sqrt(np.sqrt(num_frames * 16 * 16)), jnp.float32)

    params = (wA2T, bA2T, wA2C, bA2C,
              wB2T, bB2T, wB2C, bB2C,
              wD2T, bD2T, wD2C, bD2C, scale)

    out = separable_nl_channel(x, params)
    out = jax.block_until_ready(out)
    ref = _reference(x, params)

    assert out.shape == x.shape and out.dtype == x.dtype
    if bool(jnp.allclose(out, ref, atol=1e-3, rtol=1e-3)):
        print("KERNEL_OK")
    else:
        print("KERNEL_MISMATCH max_abs_err=%.3e" % float(jnp.max(jnp.abs(out - ref))))
</pallas_src>

<mosaic_0001>
module attributes {stable_mosaic.version = 11 : i64} {
  func.func @kernel(%arg0: i32, %arg1: i32, %arg2: i32, %arg3: memref<4x8x256xf32, #tpu.memory_space<vmem>>, %arg4: memref<4x4xf32, #tpu.memory_space<smem>>, %arg5: memref<4x4xf32, #tpu.memory_space<smem>>, %arg6: memref<1x8x8xf32, #tpu.memory_space<vmem>>, %arg7: memref<1x8x8xf32, #tpu.memory_space<vmem>>, %arg8: memref<1x4x8xf32, #tpu.memory_space<vmem>>) attributes {dimension_semantics = [#tpu.dimension_semantics<parallel>, #tpu.dimension_semantics<parallel>, #tpu.dimension_semantics<arbitrary>], iteration_bounds = array<i64: 2, 1, 1>, scalar_prefetch = 0 : i64, scratch_operands = 0 : i64, tpu.core_type = #tpu.core_type<tc>, window_params = [{transform_indices = @transform_0, window_bounds = array<i64: 4, 8, 256>}, {transform_indices = @transform_1, window_bounds = array<i64: 4, 4>}, {transform_indices = @transform_2, window_bounds = array<i64: 4, 4>}, {transform_indices = @transform_3, window_bounds = array<i64: 1, 8, 8>}, {transform_indices = @transform_4, window_bounds = array<i64: 1, 8, 8>}, {transform_indices = @transform_5, window_bounds = array<i64: 1, 4, 8>}]} {
    %c0_i32 = arith.constant 0 : i32
    %0 = arith.cmpi eq, %arg2, %c0_i32 : i32
    %1 = arith.extui %0 : i1 to i32
    %c0_i32_0 = arith.constant 0 : i32
    %2 = arith.cmpi ne, %1, %c0_i32_0 : i32
    scf.if %2 {
      %cst_90 = arith.constant 0.000000e+00 : f32
      %165 = vector.broadcast %cst_90 : f32 to vector<1x8x8xf32>
      %c0_91 = arith.constant 0 : index
      %c0_92 = arith.constant 0 : index
      %c0_93 = arith.constant 0 : index
      %166 = vector.load %arg6[%c0_91, %c0_92, %c0_93] : memref<1x8x8xf32, #tpu.memory_space<vmem>>, vector<1x8x8xf32>
      tpu.vector_store %arg6[%c0_91, %c0_92, %c0_93], %165 {strides = array<i32>} : memref<1x8x8xf32, #tpu.memory_space<vmem>>, vector<1x8x8xf32>,
      %cst_94 = arith.constant 0.000000e+00 : f32
      %167 = vector.broadcast %cst_94 : f32 to vector<1x8x8xf32>
      %c0_95 = arith.constant 0 : index
      %c0_96 = arith.constant 0 : index
      %c0_97 = arith.constant 0 : index
      %168 = vector.load %arg7[%c0_95, %c0_96, %c0_97] : memref<1x8x8xf32, #tpu.memory_space<vmem>>, vector<1x8x8xf32>
      tpu.vector_store %arg7[%c0_95, %c0_96, %c0_97], %167 {strides = array<i32>} : memref<1x8x8xf32, #tpu.memory_space<vmem>>, vector<1x8x8xf32>,
      %cst_98 = arith.constant 0.000000e+00 : f32
      %169 = vector.broadcast %cst_98 : f32 to vector<1x4x8xf32>
      %c0_99 = arith.constant 0 : index
      %c0_100 = arith.constant 0 : index
      %c0_101 = arith.constant 0 : index
      %170 = vector.load %arg8[%c0_99, %c0_100, %c0_101] : memref<1x4x8xf32, #tpu.memory_space<vmem>>, vector<1x4x8xf32>
      tpu.vector_store %arg8[%c0_99, %c0_100, %c0_101], %169 {strides = array<i32>} : memref<1x4x8xf32, #tpu.memory_space<vmem>>, vector<1x4x8xf32>,
    } else {
    }
    %c0 = arith.constant 0 : index
    %c0_1 = arith.constant 0 : index
    %c0_2 = arith.constant 0 : index
    %3 = vector.load %arg3[%c0, %c0_1, %c0_2] : memref<4x8x256xf32, #tpu.memory_space<vmem>>, vector<4x8x256xf32>
    %4 = vector.extract_strided_slice %3 {offsets = [0, 0, 0], sizes = [1, 8, 256], strides = [1, 1, 1]} : vector<4x8x256xf32> to vector<1x8x256xf32>
    %5 = vector.shape_cast %4 : vector<1x8x256xf32> to vector<8x256xf32>
    %6 = vector.extract_strided_slice %3 {offsets = [1, 0, 0], sizes = [1, 8, 256], strides = [1, 1, 1]} : vector<4x8x256xf32> to vector<1x8x256xf32>
    %7 = vector.shape_cast %6 : vector<1x8x256xf32> to vector<8x256xf32>
    %8 = vector.extract_strided_slice %3 {offsets = [2, 0, 0], sizes = [1, 8, 256], strides = [1, 1, 1]} : vector<4x8x256xf32> to vector<1x8x256xf32>
    %9 = vector.shape_cast %8 : vector<1x8x256xf32> to vector<8x256xf32>
    %10 = vector.extract_strided_slice %3 {offsets = [3, 0, 0], sizes = [1, 8, 256], strides = [1, 1, 1]} : vector<4x8x256xf32> to vector<1x8x256xf32>
    %11 = vector.shape_cast %10 : vector<1x8x256xf32> to vector<8x256xf32>
    %cst = arith.constant dense<0.000000e+00> : vector<8x8xf32>
    %12 = tpu.matmul %5, %5, %cst {dimension_numbers = #tpu.dot_dimension_numbers<[1], [1], [0], [0], [0, 0, 1, 0], [], []>, precision = #tpu.contract_precision<fp32>} : vector<8x256xf32>, vector<8x256xf32>, vector<8x8xf32> -> vector<8x8xf32>
    %c0_3 = arith.constant 0 : index
    %c0_4 = arith.constant 0 : index
    %13 = memref.load %arg4[%c0_3, %c0_4] : memref<4x4xf32, #tpu.memory_space<smem>>
    %14 = vector.broadcast %13 : f32 to vector<8x256xf32>
    %15 = arith.mulf %5, %14 : vector<8x256xf32>
    %c0_5 = arith.constant 0 : index
    %c0_6 = arith.constant 0 : index
    %16 = memref.load %arg5[%c0_5, %c0_6] : memref<4x4xf32, #tpu.memory_space<smem>>
    %17 = vector.broadcast %16 : f32 to vector<8x256xf32>
    %18 = arith.mulf %5, %17 : vector<8x256xf32>
    %c0_7 = arith.constant 0 : index
    %c1 = arith.constant 1 : index
    %19 = memref.load %arg4[%c0_7, %c1] : memref<4x4xf32, #tpu.memory_space<smem>>
    %20 = vector.broadcast %19 : f32 to vector<8x256xf32>
    %21 = arith.mulf %7, %20 : vector<8x256xf32>
    %22 = arith.addf %15, %21 : vector<8x256xf32>
    %c0_8 = arith.constant 0 : index
    %c1_9 = arith.constant 1 : index
    %23 = memref.load %arg5[%c0_8, %c1_9] : memref<4x4xf32, #tpu.memory_space<smem>>
    %24 = vector.broadcast %23 : f32 to vector<8x256xf32>
    %25 = arith.mulf %7, %24 : vector<8x256xf32>
    %26 = arith.addf %18, %25 : vector<8x256xf32>
    %c0_10 = arith.constant 0 : index
    %c2 = arith.constant 2 : index
    %27 = memref.load %arg4[%c0_10, %c2] : memref<4x4xf32, #tpu.memory_space<smem>>
    %28 = vector.broadcast %27 : f32 to vector<8x256xf32>
    %29 = arith.mulf %9, %28 : vector<8x256xf32>
    %30 = arith.addf %22, %29 : vector<8x256xf32>
    %c0_11 = arith.constant 0 : index
    %c2_12 = arith.constant 2 : index
    %31 = memref.load %arg5[%c0_11, %c2_12] : memref<4x4xf32, #tpu.memory_space<smem>>
    %32 = vector.broadcast %31 : f32 to vector<8x256xf32>
    %33 = arith.mulf %9, %32 : vector<8x256xf32>
    %34 = arith.addf %26, %33 : vector<8x256xf32>
    %c0_13 = arith.constant 0 : index
    %c3 = arith.constant 3 : index
    %35 = memref.load %arg4[%c0_13, %c3] : memref<4x4xf32, #tpu.memory_space<smem>>
    %36 = vector.broadcast %35 : f32 to vector<8x256xf32>
    %37 = arith.mulf %11, %36 : vector<8x256xf32>
    %38 = arith.addf %30, %37 : vector<8x256xf32>
    %c0_14 = arith.constant 0 : index
    %c3_15 = arith.constant 3 : index
    %39 = memref.load %arg5[%c0_14, %c3_15] : memref<4x4xf32, #tpu.memory_space<smem>>
    %40 = vector.broadcast %39 : f32 to vector<8x256xf32>
    %41 = arith.mulf %11, %40 : vector<8x256xf32>
    %42 = arith.addf %34, %41 : vector<8x256xf32>
    %cst_16 = arith.constant dense<0.000000e+00> : vector<8x8xf32>
    %43 = tpu.matmul %38, %42, %cst_16 {dimension_numbers = #tpu.dot_dimension_numbers<[1], [1], [0], [0], [0, 0, 1, 0], [], []>, precision = #tpu.contract_precision<fp32>} : vector<8x256xf32>, vector<8x256xf32>, vector<8x8xf32> -> vector<8x8xf32>
    %cst_17 = arith.constant dense<0.000000e+00> : vector<8x8xf32>
    %44 = tpu.matmul %7, %7, %cst_17 {dimension_numbers = #tpu.dot_dimension_numbers<[1], [1], [0], [0], [0, 0, 1, 0], [], []>, precision = #tpu.contract_precision<fp32>} : vector<8x256xf32>, vector<8x256xf32>, vector<8x8xf32> -> vector<8x8xf32>
    %45 = arith.addf %12, %44 : vector<8x8xf32>
    %c1_18 = arith.constant 1 : index
    %c0_19 = arith.constant 0 : index
    %46 = memref.load %arg4[%c1_18, %c0_19] : memref<4x4xf32, #tpu.memory_space<smem>>
    %47 = vector.broadcast %46 : f32 to vector<8x256xf32>
    %48 = arith.mulf %5, %47 : vector<8x256xf32>
    %c1_20 = arith.constant 1 : index
    %c0_21 = arith.constant 0 : index
    %49 = memref.load %arg5[%c1_20, %c0_21] : memref<4x4xf32, #tpu.memory_space<smem>>
    %50 = vector.broadcast %49 : f32 to vector<8x256xf32>
    %51 = arith.mulf %5, %50 : vector<8x256xf32>
    %c1_22 = arith.constant 1 : index
    %c1_23 = arith.constant 1 : index
    %52 = memref.load %arg4[%c1_22, %c1_23] : memref<4x4xf32, #tpu.memory_space<smem>>
    %53 = vector.broadcast %52 : f32 to vector<8x256xf32>
    %54 = arith.mulf %7, %53 : vector<8x256xf32>
    %55 = arith.addf %48, %54 : vector<8x256xf32>
    %c1_24 = arith.constant 1 : index
    %c1_25 = arith.constant 1 : index
    %56 = memref.load %arg5[%c1_24, %c1_25] : memref<4x4xf32, #tpu.memory_space<smem>>
    %57 = vector.broadcast %56 : f32 to vector<8x256xf32>
    %58 = arith.mulf %7, %57 : vector<8x256xf32>
    %59 = arith.addf %51, %58 : vector<8x256xf32>
    %c1_26 = arith.constant 1 : index
    %c2_27 = arith.constant 2 : index
    %60 = memref.load %arg4[%c1_26, %c2_27] : memref<4x4xf32, #tpu.memory_space<smem>>
    %61 = vector.broadcast %60 : f32 to vector<8x256xf32>
    %62 = arith.mulf %9, %61 : vector<8x256xf32>
    %63 = arith.addf %55, %62 : vector<8x256xf32>
    %c1_28 = arith.constant 1 : index
    %c2_29 = arith.constant 2 : index
    %64 = memref.load %arg5[%c1_28, %c2_29] : memref<4x4xf32, #tpu.memory_space<smem>>
    %65 = vector.broadcast %64 : f32 to vector<8x256xf32>
    %66 = arith.mulf %9, %65 : vector<8x256xf32>
    %67 = arith.addf %59, %66 : vector<8x256xf32>
    %c1_30 = arith.constant 1 : index
    %c3_31 = arith.constant 3 : index
    %68 = memref.load %arg4[%c1_30, %c3_31] : memref<4x4xf32, #tpu.memory_space<smem>>
    %69 = vector.broadcast %68 : f32 to vector<8x256xf32>
    %70 = arith.mulf %11, %69 : vector<8x256xf32>
    %71 = arith.addf %63, %70 : vector<8x256xf32>
    %c1_32 = arith.constant 1 : index
    %c3_33 = arith.constant 3 : index
    %72 = memref.load %arg5[%c1_32, %c3_33] : memref<4x4xf32, #tpu.memory_space<smem>>
    %73 = vector.broadcast %72 : f32 to vector<8x256xf32>
    %74 = arith.mulf %11, %73 : vector<8x256xf32>
    %75 = arith.addf %67, %74 : vector<8x256xf32>
    %cst_34 = arith.constant dense<0.000000e+00> : vector<8x8xf32>
    %76 = tpu.matmul %71, %75, %cst_34 {dimension_numbers = #tpu.dot_dimension_numbers<[1], [1], [0], [0], [0, 0, 1, 0], [], []>, precision = #tpu.contract_precision<fp32>} : vector<8x256xf32>, vector<8x256xf32>, vector<8x8xf32> -> vector<8x8xf32>
    %77 = arith.addf %43, %76 : vector<8x8xf32>
    %cst_35 = arith.constant dense<0.000000e+00> : vector<8x8xf32>
    %78 = tpu.matmul %9, %9, %cst_35 {dimension_numbers = #tpu.dot_dimension_numbers<[1], [1], [0], [0], [0, 0, 1, 0], [], []>, precision = #tpu.contract_precision<fp32>} : vector<8x256xf32>, vector<8x256xf32>, vector<8x8xf32> -> vector<8x8xf32>
    %79 = arith.addf %45, %78 : vector<8x8xf32>
    %c2_36 = arith.constant 2 : index
    %c0_37 = arith.constant 0 : index
    %80 = memref.load %arg4[%c2_36, %c0_37] : memref<4x4xf32, #tpu.memory_space<smem>>
    %81 = vector.broadcast %80 : f32 to vector<8x256xf32>
    %82 = arith.mulf %5, %81 : vector<8x256xf32>
    %c2_38 = arith.constant 2 : index
    %c0_39 = arith.constant 0 : index
    %83 = memref.load %arg5[%c2_38, %c0_39] : memref<4x4xf32, #tpu.memory_space<smem>>
    %84 = vector.broadcast %83 : f32 to vector<8x256xf32>
    %85 = arith.mulf %5, %84 : vector<8x256xf32>
    %c2_40 = arith.constant 2 : index
    %c1_41 = arith.constant 1 : index
    %86 = memref.load %arg4[%c2_40, %c1_41] : memref<4x4xf32, #tpu.memory_space<smem>>
    %87 = vector.broadcast %86 : f32 to vector<8x256xf32>
    %88 = arith.mulf %7, %87 : vector<8x256xf32>
    %89 = arith.addf %82, %88 : vector<8x256xf32>
    %c2_42 = arith.constant 2 : index
    %c1_43 = arith.constant 1 : index
    %90 = memref.load %arg5[%c2_42, %c1_43] : memref<4x4xf32, #tpu.memory_space<smem>>
    %91 = vector.broadcast %90 : f32 to vector<8x256xf32>
    %92 = arith.mulf %7, %91 : vector<8x256xf32>
    %93 = arith.addf %85, %92 : vector<8x256xf32>
    %c2_44 = arith.constant 2 : index
    %c2_45 = arith.constant 2 : index
    %94 = memref.load %arg4[%c2_44, %c2_45] : memref<4x4xf32, #tpu.memory_space<smem>>
    %95 = vector.broadcast %94 : f32 to vector<8x256xf32>
    %96 = arith.mulf %9, %95 : vector<8x256xf32>
    %97 = arith.addf %89, %96 : vector<8x256xf32>
    %c2_46 = arith.constant 2 : index
    %c2_47 = arith.constant 2 : index
    %98 = memref.load %arg5[%c2_46, %c2_47] : memref<4x4xf32, #tpu.memory_space<smem>>
    %99 = vector.broadcast %98 : f32 to vector<8x256xf32>
    %100 = arith.mulf %9, %99 : vector<8x256xf32>
    %101 = arith.addf %93, %100 : vector<8x256xf32>
    %c2_48 = arith.constant 2 : index
    %c3_49 = arith.constant 3 : index
    %102 = memref.load %arg4[%c2_48, %c3_49] : memref<4x4xf32, #tpu.memory_space<smem>>
    %103 = vector.broadcast %102 : f32 to vector<8x256xf32>
    %104 = arith.mulf %11, %103 : vector<8x256xf32>
    %105 = arith.addf %97, %104 : vector<8x256xf32>
    %c2_50 = arith.constant 2 : index
    %c3_51 = arith.constant 3 : index
    %106 = memref.load %arg5[%c2_50, %c3_51] : memref<4x4xf32, #tpu.memory_space<smem>>
    %107 = vector.broadcast %106 : f32 to vector<8x256xf32>
    %108 = arith.mulf %11, %107 : vector<8x256xf32>
    %109 = arith.addf %101, %108 : vector<8x256xf32>
    %cst_52 = arith.constant dense<0.000000e+00> : vector<8x8xf32>
    %110 = tpu.matmul %105, %109, %cst_52 {dimension_numbers = #tpu.dot_dimension_numbers<[1], [1], [0], [0], [0, 0, 1, 0], [], []>, precision = #tpu.contract_precision<fp32>} : vector<8x256xf32>, vector<8x256xf32>, vector<8x8xf32> -> vector<8x8xf32>
    %111 = arith.addf %77, %110 : vector<8x8xf32>
    %cst_53 = arith.constant dense<0.000000e+00> : vector<8x8xf32>
    %112 = tpu.matmul %11, %11, %cst_53 {dimension_numbers = #tpu.dot_dimension_numbers<[1], [1], [0], [0], [0, 0, 1, 0], [], []>, precision = #tpu.contract_precision<fp32>} : vector<8x256xf32>, vector<8x256xf32>, vector<8x8xf32> -> vector<8x8xf32>
    %113 = arith.addf %79, %112 : vector<8x8xf32>
    %c3_54 = arith.constant 3 : index
    %c0_55 = arith.constant 0 : index
    %114 = memref.load %arg4[%c3_54, %c0_55] : memref<4x4xf32, #tpu.memory_space<smem>>
    %115 = vector.broadcast %114 : f32 to vector<8x256xf32>
    %116 = arith.mulf %5, %115 : vector<8x256xf32>
    %c3_56 = arith.constant 3 : index
    %c0_57 = arith.constant 0 : index
    %117 = memref.load %arg5[%c3_56, %c0_57] : memref<4x4xf32, #tpu.memory_space<smem>>
    %118 = vector.broadcast %117 : f32 to vector<8x256xf32>
    %119 = arith.mulf %5, %118 : vector<8x256xf32>
    %c3_58 = arith.constant 3 : index
    %c1_59 = arith.constant 1 : index
    %120 = memref.load %arg4[%c3_58, %c1_59] : memref<4x4xf32, #tpu.memory_space<smem>>
    %121 = vector.broadcast %120 : f32 to vector<8x256xf32>
    %122 = arith.mulf %7, %121 : vector<8x256xf32>
    %123 = arith.addf %116, %122 : vector<8x256xf32>
    %c3_60 = arith.constant 3 : index
    %c1_61 = arith.constant 1 : index
    %124 = memref.load %arg5[%c3_60, %c1_61] : memref<4x4xf32, #tpu.memory_space<smem>>
    %125 = vector.broadcast %124 : f32 to vector<8x256xf32>
    %126 = arith.mulf %7, %125 : vector<8x256xf32>
    %127 = arith.addf %119, %126 : vector<8x256xf32>
    %c3_62 = arith.constant 3 : index
    %c2_63 = arith.constant 2 : index
    %128 = memref.load %arg4[%c3_62, %c2_63] : memref<4x4xf32, #tpu.memory_space<smem>>
    %129 = vector.broadcast %128 : f32 to vector<8x256xf32>
    %130 = arith.mulf %9, %129 : vector<8x256xf32>
    %131 = arith.addf %123, %130 : vector<8x256xf32>
    %c3_64 = arith.constant 3 : index
    %c2_65 = arith.constant 2 : index
    %132 = memref.load %arg5[%c3_64, %c2_65] : memref<4x4xf32, #tpu.memory_space<smem>>
    %133 = vector.broadcast %132 : f32 to vector<8x256xf32>
    %134 = arith.mulf %9, %133 : vector<8x256xf32>
    %135 = arith.addf %127, %134 : vector<8x256xf32>
    %c3_66 = arith.constant 3 : index
    %c3_67 = arith.constant 3 : index
    %136 = memref.load %arg4[%c3_66, %c3_67] : memref<4x4xf32, #tpu.memory_space<smem>>
    %137 = vector.broadcast %136 : f32 to vector<8x256xf32>
    %138 = arith.mulf %11, %137 : vector<8x256xf32>
    %139 = arith.addf %131, %138 : vector<8x256xf32>
    %c3_68 = arith.constant 3 : index
    %c3_69 = arith.constant 3 : index
    %140 = memref.load %arg5[%c3_68, %c3_69] : memref<4x4xf32, #tpu.memory_space<smem>>
    %141 = vector.broadcast %140 : f32 to vector<8x256xf32>
    %142 = arith.mulf %11, %141 : vector<8x256xf32>
    %143 = arith.addf %135, %142 : vector<8x256xf32>
    %cst_70 = arith.constant dense<0.000000e+00> : vector<8x8xf32>
    %144 = tpu.matmul %139, %143, %cst_70 {dimension_numbers = #tpu.dot_dimension_numbers<[1], [1], [0], [0], [0, 0, 1, 0], [], []>, precision = #tpu.contract_precision<fp32>} : vector<8x256xf32>, vector<8x256xf32>, vector<8x8xf32> -> vector<8x8xf32>
    %145 = arith.addf %111, %144 : vector<8x8xf32>
    %c0_71 = arith.constant 0 : index
    %c0_72 = arith.constant 0 : index
    %c0_73 = arith.constant 0 : index
    %146 = vector.load %arg6[%c0_71, %c0_72, %c0_73] : memref<1x8x8xf32, #tpu.memory_space<vmem>>, vector<1x8x8xf32>
    %147 = vector.shape_cast %146 : vector<1x8x8xf32> to vector<8x8xf32>
    %148 = arith.addf %147, %145 : vector<8x8xf32>
    %c0_74 = arith.constant 0 : index
    %c0_75 = arith.constant 0 : index
    %c0_76 = arith.constant 0 : index
    %149 = vector.load %arg6[%c0_74, %c0_75, %c0_76] : memref<1x8x8xf32, #tpu.memory_space<vmem>>, vector<1x8x8xf32>
    %150 = vector.shape_cast %149 : vector<1x8x8xf32> to vector<8x8xf32>
    %151 = vector.shape_cast %148 : vector<8x8xf32> to vector<1x8x8xf32>
    tpu.vector_store %arg6[%c0_74, %c0_75, %c0_76], %151 {strides = array<i32>} : memref<1x8x8xf32, #tpu.memory_space<vmem>>, vector<1x8x8xf32>,
    %c0_77 = arith.constant 0 : index
    %c0_78 = arith.constant 0 : index
    %c0_79 = arith.constant 0 : index
    %152 = vector.load %arg7[%c0_77, %c0_78, %c0_79] : memref<1x8x8xf32, #tpu.memory_space<vmem>>, vector<1x8x8xf32>
    %153 = vector.shape_cast %152 : vector<1x8x8xf32> to vector<8x8xf32>
    %154 = arith.addf %153, %113 : vector<8x8xf32>
    %c0_80 = arith.constant 0 : index
    %c0_81 = arith.constant 0 : index
    %c0_82 = arith.constant 0 : index
    %155 = vector.load %arg7[%c0_80, %c0_81, %c0_82] : memref<1x8x8xf32, #tpu.memory_space<vmem>>, vector<1x8x8xf32>
    %156 = vector.shape_cast %155 : vector<1x8x8xf32> to vector<8x8xf32>
    %157 = vector.shape_cast %154 : vector<8x8xf32> to vector<1x8x8xf32>
    tpu.vector_store %arg7[%c0_80, %c0_81, %c0_82], %157 {strides = array<i32>} : memref<1x8x8xf32, #tpu.memory_space<vmem>>, vector<1x8x8xf32>,
    %c0_83 = arith.constant 0 : index
    %c0_84 = arith.constant 0 : index
    %c0_85 = arith.constant 0 : index
    %158 = vector.load %arg8[%c0_83, %c0_84, %c0_85] : memref<1x4x8xf32, #tpu.memory_space<vmem>>, vector<1x4x8xf32>
    %159 = vector.shape_cast %158 : vector<1x4x8xf32> to vector<4x8xf32>
    %cst_86 = arith.constant dense<0.000000e+00> : vector<4x8xf32>
    %160 = vector.multi_reduction <add>, %3, %cst_86 [2] : vector<4x8x256xf32> to vector<4x8xf32>
    %161 = arith.addf %159, %160 : vector<4x8xf32>
    %c0_87 = arith.constant 0 : index
    %c0_88 = arith.constant 0 : index
    %c0_89 = arith.constant 0 : index
    %162 = vector.load %arg8[%c0_87, %c0_88, %c0_89] : memref<1x4x8xf32, #tpu.memory_space<vmem>>, vector<1x4x8xf32>
    %163 = vector.shape_cast %162 : vector<1x4x8xf32> to vector<4x8xf32>
    %164 = vector.shape_cast %161 : vector<4x8xf32> to vector<1x4x8xf32>
    tpu.vector_store %arg8[%c0_87, %c0_88, %c0_89], %164 {strides = array<i32>} : memref<1x4x8xf32, #tpu.memory_space<vmem>>, vector<1x4x8xf32>,
    return
  }
  func.func @transform_0(%arg0: i32, %arg1: i32, %arg2: i32) -> (i32, i32, i32) {
    %c1_i32 = arith.constant 1 : i32
    %0 = arith.muli %arg1, %c1_i32 : i32
    %1 = arith.addi %0, %arg2 : i32
    %c0_i32 = arith.constant 0 : i32
    %c0_i32_0 = arith.constant 0 : i32
    return %arg0, %c0_i32, %1 : i32, i32, i32
  }
  func.func @transform_1(%arg0: i32, %arg1: i32, %arg2: i32) -> (i32, i32) {
    %c0_i32 = arith.constant 0 : i32
    %c0_i32_0 = arith.constant 0 : i32
    %c0_i32_1 = arith.constant 0 : i32
    return %c0_i32, %c0_i32_0 : i32, i32
  }
  func.func @transform_2(%arg0: i32, %arg1: i32, %arg2: i32) -> (i32, i32) {
    %c0_i32 = arith.constant 0 : i32
    %c0_i32_0 = arith.constant 0 : i32
    %c0_i32_1 = arith.constant 0 : i32
    return %c0_i32, %c0_i32_0 : i32, i32
  }
  func.func @transform_3(%arg0: i32, %arg1: i32, %arg2: i32) -> (i32, i32, i32) {
    %c1_i32 = arith.constant 1 : i32
    %0 = arith.muli %arg0, %c1_i32 : i32
    %1 = arith.addi %0, %arg1 : i32
    %c0_i32 = arith.constant 0 : i32
    %c0_i32_0 = arith.constant 0 : i32
    %c0_i32_1 = arith.constant 0 : i32
    return %1, %c0_i32, %c0_i32_0 : i32, i32, i32
  }
  func.func @transform_4(%arg0: i32, %arg1: i32, %arg2: i32) -> (i32, i32, i32) {
    %c1_i32 = arith.constant 1 : i32
    %0 = arith.muli %arg0, %c1_i32 : i32
    %1 = arith.addi %0, %arg1 : i32
    %c0_i32 = arith.constant 0 : i32
    %c0_i32_0 = arith.constant 0 : i32
    %c0_i32_1 = arith.constant 0 : i32
    return %1, %c0_i32, %c0_i32_0 : i32, i32, i32
  }
  func.func @transform_5(%arg0: i32, %arg1: i32, %arg2: i32) -> (i32, i32, i32) {
    %c1_i32 = arith.constant 1 : i32
    %0 = arith.muli %arg0, %c1_i32 : i32
    %1 = arith.addi %0, %arg1 : i32
    %c0_i32 = arith.constant 0 : i32
    %c0_i32_0 = arith.constant 0 : i32
    %c0_i32_1 = arith.constant 0 : i32
    return %1, %c0_i32, %c0_i32_0 : i32, i32, i32
  }
}

</mosaic_0001>

<bundles_post_ra>
// kernel: tpu_custom_call.1
= control target key start
LH: loop header
LB: loop body
LE: loop exit
PB: predicated region body
PF: predicated region fallthrough
CT: control target
= control target key end

     0   :  { %11 = vsyncpa [#allocation3], 0  ;;  %s5847_s0 = inlined_call_operand.hbm [shape: f32[8,8,256], index: 0, kind: input, shape index: {}]   ;;  %s5848_s1 = inlined_call_operand.hbm [shape: f32[4,4], index: 1, kind: input, shape index: {}]   ;;  %s5849_s2 = inlined_call_operand.hbm [shape: f32[4,4], index: 2, kind: input, shape index: {}]   ;;  %s5850_s3 = inlined_call_operand.hbm [shape: f32[2,8,8], index: 3, kind: output, shape index: {0}]   ;;  %s5851_s4 = inlined_call_operand.hbm [shape: f32[2,8,8], index: 4, kind: output, shape index: {1}]   ;;  %s5852_s5 = inlined_call_operand.hbm [shape: f32[2,4,8], index: 5, kind: output, shape index: {2}]  }
   0x1   :  { %13 = vsyncpa [#allocation3 + $0x1], 0 }
   0x2   :  { %14 = vsyncpa [#allocation5], 0 }
   0x3   :  { %15 = vsyncpa [#allocation8], 0 }
   0x4   :  { %16 = vsyncpa [#allocation4], 0 }
   0x5   :  { %18 = vsyncpa [#allocation4 + $0x1], 0 }
   0x6   :  { %19 = vsyncpa [#allocation11], 0 }
   0x7   :  { %21 = vsyncpa [#allocation11 + $0x1], 0  ;;  %s4960_s18 = smov 0   ;;  %s4962_s19 = smov 0  }
   0x8   :  { %s4964_s20 = smov 0   ;;  %s4966_s21 = smov 0  }
   0x9   :  { %s4968_s22 = smov 0   ;;  %s4970_s23 = smov 0  }
   0xa LB: > { %5859 = sst [smem:[#allocation18_spill]] %s4899_s18  ;;  %s4991_s24 = sadd.s32 4294967295, %s4919_s23   ;;  %s4919_s23 = sphi %s4970_s23, %s27_s23   ;;  %s4915_s22 = sphi %s4968_s22, %s5881_s22   ;;  %s4911_s21 = sphi %s4966_s21, %s5880_s21   ;;  %s4907_s20 = sphi %s4964_s20, %s5879_s20   ;;  %s4903_s19 = sphi %s4962_s19, %s5878_s19   ;;  %s4899_s18 = sphi %s4960_s18, %s5877_s18  }
   0xb   : > { %5860 = sst [smem:[#allocation19_spill]] %s4919_s23  ;;  %s5853_s25 = sadd.s32 4294967294, %s4919_s23  }
   0xc   : > { %p64_p0 = scmp.ne.s32.totalorder %s4907_s20, %s4903_s19  ;;  %p65_p1 = scmp.eq.s32.totalorder %s4919_s23, 0 }
   0xd   : > { %p70_p2 = scmp.ne.s32.totalorder %s4903_s19, %s4899_s18  ;;  %p5858_p3 = scmp.eq.s32.totalorder %s4991_s24, 0 }
   0xe   : > { %p138_p4 = scmp.eq.s32.totalorder %s4991_s24, 1  ;;  %p66_p5 = por %p65_p1, %p64_p0 }
   0xf   : > { %p144_p6 = scmp.eq.s32.totalorder %s5853_s25, 1  ;;  %p5006_p7 = por %p5858_p3, %p70_p2 }
  0x10   : > { %p5010_p8 = por %p138_p4, %p64_p0  ;;  %p4574_p10 = scmp.ge.s32.totalorder %s4919_s23, 1 }
  0x11   : > { %p5014_p9 = por %p144_p6, %p70_p2  ;;  %p207_p11 = scmp.lt.s32.totalorder %s4919_s23, 3 }
  0x12   : > { %p4668_p1 = scmp.lt.s32.totalorder %s4919_s23, 2  ;;  %s238_s7 = sand.u32 1, %s4907_s20  }
  0x13   : > { %s5863_s29 = scalar_select %p5014_p9, 1, 0 }
  0x14   : > { %p5021_p13 = pnand %p4574_p10, %p207_p11  ;;  %p5028_p4 = pnand %p4668_p1, %p66_p5 }
  0x15   : > { %5864 = sst [smem:[#allocation20_spill]] %s5863_s29  ;;  %s46_s8 = sadd.s32 1, %s4915_s22 }
  0x16   : > { %p4645_p0 = pneg %p5021_p13  ;;  %p48_p6 = scmp.ge.s32.totalorder %s46_s8, 2 }
  0x17   : > { %s4921_s9 = smov [#allocation6]   ;;  %s4922_s12 = smov [#allocation7]  }
  0x18   : > { %p4646_p2 = pnand %p4645_p0, %p5858_p3  ;;  %s5883_s8 = smov (%p48_p6, %s46_s8), 0 }
  0x19   : > { %s4578_s15 = sshll.u32 %s238_s7, 6  ;;  %s4628_s16 = sshll.u32 %s4915_s22, 10 }
  0x1a   : > { %4648 = dma.hbm_to_smem (!%p4646_p2), %s5848_s1, 64, %s4921_s9, [#allocation5]  }
  0x1b   : > { %4651 = dma.hbm_to_smem (!%p4646_p2), %s5849_s2, 64, %s4922_s12, [#allocation8]  }
  0x1c   : > { %s52_s17 = ssub.s32 %s4915_s22, %s5883_s8  ;;  %s252_s23 = scalar_lea.hbm %s5847_s0, %s4628_s16 }
  0x1d   : > { %p55_p5 = scmp.eq.s32.totalorder %s52_s17, 0  ;;  %s242_s29 = scalar_lea.vmem [#allocation2], %s4578_s15 }
  0x1e   : > { %s253_s18 = sshll.u32 %s242_s29, 4  ;;  %s5867_s10 = sadd.s32 1, %s4907_s20  ;;  %s254_s18 = int_to_ptr.vmem [resolvable:$true] %s253_s18 }
  0x1f   : > { %s5053_s9 = scalar_select %p55_p5, %s4907_s20, %s5867_s10  }
  0x20   : > { %s239_s11 = scalar_lea.sflag [#allocation3], %s238_s7  ;;  %p4749_p10 = pneg %p5028_p4 }
  0x21   : > { %s4760_s12 = scalar_lea.vmem %s254_s18, 1024  ;;  %s4923_s13 = smov [#allocation2]  }
  0x22   : > { %p4761_p11 = scmp.ne.s32.totalorder %s254_s18, %s4760_s12  ;;  %s4765_s14 = sshll.u32 %s4923_s13, 4  ;;  %s4766_s14 = int_to_ptr.vmem [resolvable:$false] %s4765_s14 }
  0x23   : > { %s4767_s17 = scalar_lea.vmem %s4766_s14, 2048  ;;  %p4768_p2 = scmp.lt.s32.totalorder %s254_s18, %s4766_s14 }
  0x24   : > { %p4763_p1 = pnand %p4761_p11, %p4749_p10  ;;  %p4769_p6 = scmp.lt.s32.totalorder %s4767_s17, %s4760_s12 }
  0x26   : > { %p4764_p0 = pneg %p4763_p1  ;;  %p4770_p12 = por %p4769_p6, %p4768_p2 }
  0x28   : > { %p4771_p3 = pnand %p4770_p12, %p4764_p0 }
  0x2a   : > { %4774 = shalt.err (!%p4771_p3)
}
  0x2b   : > { %s4924_s25 = smov 256   ;;  %s4925_s26 = smov 16  }
  0x2c   : > { %4655 = dma.hbm_to_vmem [thread:$0]  (!%p5028_p4), %s252_s23, 1024, %s254_s18, %s239_s11, %s4924_s25, %s4924_s25, %s4925_s26  }
  0x2d   : > { %265 = sbr.rel (%p5021_p13) target bundleno = 412 (0x19c), region = 32  ;;  %s5062_s29 = sand.u32 (!%p5021_p13), 1, %s4903_s19  }
  0x2e   : > { %s4583_s7 = sshll.u32 (!%p5021_p13), %s5062_s29, 6  ;;  %s268_s15 = scalar_lea.sflag (!%p5021_p13), [#allocation3], %s5062_s29 }
  0x2f   : > { %s5066_s16 = scalar_lea.vmem (!%p5021_p13), [#allocation2], %s4583_s7 }
  0x32   : > { %4878 = dma.done.wait (%p5006_p7), %s268_s15, 1024  }
  0x33   : > { %4880 = vsyncadd (%p5006_p7), %s268_s15, 4294966272  ;;  %p5868_p3 = scmp.eq.s32.totalorder %s4991_s24, 0 }
  0x35   : > { %4882 = dma.done.wait (%p5868_p3), [#allocation5], 64   ;;  %p5869_p12 = pmov %p5868_p3 }
  0x36   : > { %p5870_p13 = pmov %p5868_p3 }
  0x37   : > { %4884 = vsyncadd (%p5869_p12), [#allocation5], 4294967232 }
  0x38   : > { %4886 = dma.done.wait (%p5870_p13), [#allocation8], 64   ;;  %p5871_p4 = pmov %p5868_p3 }
  0x3a   : > { %4888 = vsyncadd (%p5871_p4), [#allocation8], 4294967232 }
  0x3b   : > { %284 = sfence }
  0x3c   : > { %v5081_v0 = vld [vmem:[%s5066_s16 + $0x18] sm:$0xff]  ;;  %v5084_v1 = vld [vmem:[%s5066_s16 + $0x10] sm:$0xff]  ;;  %v5087_v2 = vld [vmem:[%s5066_s16 + $0x8] sm:$0xff]  ;;  %s5089_s18 = sld [smem:[#allocation7 + $0x80]]  ;;  %vm327_vm0 = vcmask 64512   ;;  %vm330_vm1 = vcmask 60416  }
  0x3d   : > { %v5092_v3 = vand.u32 4294901760, %v5081_v0  ;;  %v5095_v4 = vand.u32 4294901760, %v5084_v1  ;;  %v5098_v5 = vand.u32 4294901760, %v5087_v2  ;;  %v5101_v6 = vld [vmem:[%s5066_s16] sm:$0xff]  ;;  %s5106_s23 = sld [smem:[#allocation7 + $0x81]]  ;;  %v4307_v13 = vadd.f32 %v5081_v0, %v5084_v1  ;;  %v5158_v23 = vld [vmem:[%s5066_s16 + $0x28] sm:$0xff] }
  0x3e   : > { %v5104_v7 = vand.u32 4294901760, %v5101_v6  ;;  %v4304_v8 = vadd.f32 %v5087_v2, %v5101_v6  ;;  %s5122_s27 = sld [smem:[#allocation7 + $0x82]]  ;;  %v5161_v24 = vld [vmem:[%s5066_s16 + $0x38] sm:$0xff]  ;;  %v5171_v31 = vld [vmem:[%s5066_s16 + $0x20] sm:$0xff]  ;;  %v5174_v32 = vld [vmem:[%s5066_s16 + $0x30] sm:$0xff]  ;;  %vm4338_vm2 = vcmask 1041409  }
  0x3f   : > { %415 = vmatprep.subr.mxu0 %v5092_v3  ;;  %v451_v9 = vsub.f32 %v5081_v0, %v5092_v3  ;;  %v5115_v10 = vsub.f32 %v5084_v1, %v5095_v4  ;;  %541 = vmatprep.mubr.f32.mxu1 %v5092_v3  ;;  %v5120_v11 = vsub.f32 %v5087_v2, %v5098_v5  ;;  %s5129_s30 = sld [smem:[#allocation7 + $0x83]]  ;;  %vm4340_vm3 = vcmask 1042434  }
  0x40   : > { %417 = vmatpush1.xpose.msra.mxu0 %v5095_v4  ;;  %v5127_v12 = vsub.f32 %v5101_v6, %v5104_v7  ;;  %4305 = vadd.xlane.f32.xlu0 %v4304_v8  ;;  %s5141_s6 = sld [smem:[#allocation6 + $0x80]]  ;;  %vm4342_vm4 = vcmask 1043459  }
  0x41   : > { %v5133_v14 = vand.u32 4294901760, %v451_v9  ;;  %v5136_v15 = vand.u32 4294901760, %v5115_v10  ;;  %580 = vmatprep.subr.mxu0 %v451_v9  ;;  %v5139_v16 = vand.u32 4294901760, %v5120_v11  ;;  %s5147_s10 = sld [smem:[#allocation6 + $0x81]] }
  0x42   : > { %v5144_v17 = vand.u32 4294901760, %v5127_v12  ;;  %v1333_v18 = vstv %s5089_s18  ;;  %s5155_s11 = sld [smem:[#allocation6 + $0x82]] }
  0x43   : > { %v453_v19 = vsub.f32 %v451_v9, %v5133_v14  ;;  %v459_v20 = vsub.f32 %v5115_v10, %v5136_v15  ;;  %v925_v21 = vsub.f32 %v5120_v11, %v5139_v16  ;;  %v1335_v22 = vmul.f32 %v1333_v18, %v5087_v2  ;;  %s5165_s12 = sld [smem:[#allocation6 + $0x83]] }
  0x44   : > { %v1343_v25 = vstv %s5106_s23  ;;  %v1334_v26 = vmul.f32 %v1333_v18, %v5101_v6  ;;  %4308 = vadd.xlane.f32.xlu0 %v4307_v13  ;;  %v931_v29 = vsub.f32 %v5127_v12, %v5144_v17  ;;  %s5176_s13 = sld [smem:[#allocation7]]  ;;  %v1355_v34 = vstv %s5122_s27 }
  0x45   : > { %v454_v27 = vand.u32 4294901760, %v453_v19  ;;  %v460_v28 = vand.u32 4294901760, %v459_v20  ;;  %v1345_v30 = vmul.f32 %v1343_v25, %v5081_v0  ;;  %v5178_v33 = vand.u32 4294901760, %v925_v21  ;;  %s5183_s14 = sld [smem:[#allocation7 + $0x1]] }
  0x46   : > { %v1367_v35 = vstv %s5129_s30  ;;  %v1344_v36 = vmul.f32 %v1343_v25, %v5084_v1  ;;  %v1357_v38 = vmul.f32 %v1355_v34, %v5158_v23  ;;  %v1329_v40 = vstv %s5141_s6  ;;  %s5188_s17 = sld [smem:[#allocation7 + $0x2]] }
  0x47   : > { %455 = vmatprep.mubr.f32.mxu0 %v454_v27  ;;  %501 = vmatprep.subr.mxu1 %v454_v27  ;;  %v1347_v37 = vadd.f32 %v1345_v30, %v1335_v22  ;;  %v1369_v39 = vmul.f32 %v1367_v35, %v5161_v24  ;;  %v1356_v42 = vmul.f32 %v1355_v34, %v5171_v31  ;;  %v1337_v44 = vstv %s5147_s10  ;;  %s5193_s25 = sld [smem:[#allocation7 + $0x3]] }
  0x48   : > { %461 = vmatmul.mubr.f32.vlgmr.msra.gmra.mxu0 %v460_v28  ;;  %507 = vmatpush1.xpose.msra.mxu1 %v460_v28  ;;  %v1346_v41 = vadd.f32 %v1344_v36, %v1334_v26  ;;  %v1368_v43 = vmul.f32 %v1367_v35, %v5174_v32  ;;  %v1330_v46 = vmul.f32 %v1329_v40, %v5101_v6  ;;  %v1349_v48 = vstv %s5155_s11  ;;  %s5208_s26 = sld [smem:[#allocation6]] }
  0x49   : > { %583 = vmatpush1.xpose.msra.mxu0 %v5115_v10  ;;  %618 = vmatprep.mubr.f32.mxu0 %v451_v9  ;;  %v1359_v45 = vadd.f32 %v1357_v38, %v1347_v37  ;;  %v1331_v47 = vmul.f32 %v1329_v40, %v5087_v2  ;;  %v1338_v50 = vmul.f32 %v1337_v44, %v5084_v1  ;;  %v1361_v52 = vstv %s5165_s12  ;;  %s5214_s7 = sld [smem:[#allocation6 + $0x1]] }
  0x4a   : > { %657 = vmatprep.subr.mxu1 %v5092_v3  ;;  %737 = vmatprep.subr.mxu0 %v5133_v14  ;;  %v1358_v49 = vadd.f32 %v1356_v42, %v1346_v41  ;;  %v1339_v51 = vmul.f32 %v1337_v44, %v5081_v0  ;;  %v1350_v54 = vmul.f32 %v1349_v48, %v5171_v31  ;;  %v345_v60 = vstv %s5176_s13  ;;  %s5235_s15 = sld [smem:[#allocation6 + $0x2]] }
  0x4b   : > { %543 = vmatmul.mubr.f32.vlgmr.msra.gmra.mxu1 %v5095_v4  ;;  %v1371_v53 = vadd.f32 %v1369_v39, %v1359_v45  ;;  %v1351_v55 = vmul.f32 %v1349_v48, %v5158_v23  ;;  %v1362_v56 = vmul.f32 %v1361_v52, %v5174_v32  ;;  %v1363_v59 = vmul.f32 %v1361_v52, %v5161_v24  ;;  %s5245_s16 = sld [smem:[#allocation6 + $0x3]] }
  0x4c   : > { %621 = vmatmul.mubr.f32.vlgmr.msra.gmra.mxu0 %v5115_v10  ;;  %659 = vmatpush1.xpose.msra.mxu1 %v5095_v4  ;;  %v1370_v57 = vadd.f32 %v1368_v43, %v1358_v49  ;;  %v1341_v58 = vadd.f32 %v1339_v51, %v1331_v47  ;;  %v1340_v62 = vadd.f32 %v1338_v50, %v1330_v46  ;;  %v355_v8 = vstv %s5183_s14  ;;  %s5274_s18 = sld [smem:[#allocation7 + $0x100]] }
  0x4d   : > { %741 = vmatpush1.xpose.msra.mxu0 %v5136_v15  ;;  %695 = vmatprep.mubr.f32.mxu1 %v5133_v14  ;;  %v5218_v61 = vand.u32 4294901760, %v1371_v53  ;;  %v347_v63 = vmul.f32 %v345_v60, %v5087_v2  ;;  %v357_v13 = vmul.f32 %v355_v8, %v5081_v0  ;;  %v367_v18 = vstv %s5188_s17  ;;  %s5289_s23 = sld [smem:[#allocation7 + $0x101]] }
  0x4e   : > { %775 = vmatprep.mubr.f32.mxu0 %v5092_v3  ;;  %813 = vmatprep.subr.mxu1 %v5092_v3  ;;  %v5224_v9 = vand.u32 4294901760, %v1370_v57  ;;  %v1353_v10 = vadd.f32 %v1351_v55, %v1341_v58  ;;  %v1352_v19 = vadd.f32 %v1350_v54, %v1340_v62  ;;  %v369_v20 = vmul.f32 %v367_v18, %v5158_v23  ;;  %s5298_s27 = sld [smem:[#allocation7 + $0x102]] }
  0x4f   : > { %699 = vmatmul.mubr.f32.vlgmr.msra.gmra.mxu1 %v5136_v15  ;;  %887 = vmatprep.subr.mxu0 %v5098_v5  ;;  %v5231_v14 = vsub.f32 %v1371_v53, %v5218_v61  ;;  %v379_v21 = vstv %s5193_s25  ;;  %v932_v22 = vand.u32 4294901760, %v931_v29  ;;  %v359_v26 = vadd.f32 %v357_v13, %v347_v63  ;;  %s5315_s30 = sld [smem:[#allocation7 + $0x103]] }
  0x50   : > { %777 = vmatmul.mubr.f32.vlgmr.msra.gmra.mxu0 %v5095_v4  ;;  %815 = vmatpush1.xpose.msra.mxu1 %v5095_v4  ;;  %v5243_v15 = vsub.f32 %v1370_v57, %v5224_v9  ;;  %v1365_v25 = vadd.f32 %v1363_v59, %v1353_v10  ;;  %v1364_v28 = vadd.f32 %v1362_v56, %v1352_v19  ;;  %v341_v39 = vstv %s5208_s26  ;;  %s5323_s6 = sld [smem:[#allocation6 + $0x100]] }
  0x51   : > { %889 = vmatpush1.xpose.msra.mxu0 %v5104_v7  ;;  %849 = vmatprep.mubr.f32.mxu1 %v5092_v3  ;;  %v1486_v27 = vand.u32 4294901760, %v5231_v14  ;;  %v381_v30 = vmul.f32 %v379_v21, %v5161_v24  ;;  %v346_v34 = vmul.f32 %v345_v60, %v5101_v6  ;;  %v371_v36 = vadd.f32 %v369_v20, %v359_v26  ;;  %s5340_s10 = sld [smem:[#allocation6 + $0x101]] }
  0x52   : > { %927 = vmatprep.mubr.f32.mxu0 %v5178_v33  ;;  %973 = vmatprep.subr.mxu1 %v5178_v33  ;;  %v5254_v29 = vand.u32 4294901760, %v1365_v25  ;;  %v1492_v35 = vand.u32 4294901760, %v5243_v15  ;;  %v356_v3 = vmul.f32 %v355_v8, %v5084_v1  ;;  %v5265_v38 = vand.u32 4294901760, %v1364_v28  ;;  %s5352_s11 = sld [smem:[#allocation6 + $0x102]] }
  0x53   : > { %851 = vmatmul.mubr.f32.vlgmr.msra.gmra.mxu1 %v5095_v4  ;;  %1052 = vmatprep.subr.mxu0 %v5120_v11  ;;  %v5263_v37 = vsub.f32 %v5231_v14, %v1486_v27  ;;  %v368_v33 = vmul.f32 %v367_v18, %v5171_v31  ;;  %v383_v41 = vadd.f32 %v381_v30, %v371_v36  ;;  %v349_v42 = vstv %s5214_s7  ;;  %s5372_s12 = sld [smem:[#allocation6 + $0x103]] }
  0x54   : > { %933 = vmatmul.mubr.f32.vlgmr.msra.gmra.mxu0 %v932_v22  ;;  %979 = vmatpush1.xpose.msra.mxu1 %v932_v22  ;;  %v5270_v40 = vsub.f32 %v1365_v25, %v5254_v29  ;;  %v380_v4 = vmul.f32 %v379_v21, %v5174_v32  ;;  %v5279_v43 = vsub.f32 %v1364_v28, %v5265_v38  ;;  %v5287_v46 = vand.u32 4294901760, %v5158_v23  ;;  %s5399_s13 = sld [smem:[#allocation7 + $0x180]] }
  0x55   : > { %1055 = vmatpush1.xpose.msra.mxu0 %v5127_v12  ;;  %1013 = vmatprep.mubr.f32.mxu1 %v5098_v5  ;;  %v5284_v44 = vsub.f32 %v5243_v15, %v1492_v35  ;;  %v358_v45 = vadd.f32 %v356_v3, %v346_v34  ;;  %v5294_v48 = vand.u32 4294901760, %v383_v41  ;;  %v342_v49 = vmul.f32 %v341_v39, %v5101_v6  ;;  %s5416_s14 = sld [smem:[#allocation7 + $0x181]] }
  0x56   : > { %1090 = vmatprep.mubr.f32.mxu0 %v5120_v11  ;;  %1129 = vmatprep.subr.mxu1 %v5098_v5  ;;  %v1440_v47 = vand.u32 4294901760, %v5270_v40  ;;  %v343_v50 = vmul.f32 %v341_v39, %v5087_v2  ;;  %v1446_v11 = vand.u32 4294901760, %v5279_v43  ;;  %v350_v52 = vmul.f32 %v349_v42, %v5084_v1  ;;  %s5452_s17 = sld [smem:[#allocation6 + $0x180]] }
  0x57   : > { %1015 = vmatmul.mubr.f32.vlgmr.msra.gmra.mxu1 %v5104_v7  ;;  %1209 = vmatprep.subr.mxu0 %v5139_v16  ;;  %v370_v51 = vadd.f32 %v368_v33, %v358_v45  ;;  %v351_v53 = vmul.f32 %v349_v42, %v5081_v0  ;;  %v361_v55 = vstv %s5235_s15  ;;  %v373_v56 = vstv %s5245_s16  ;;  %s5455_s25 = sld [smem:[#allocation6 + $0x181]] }
  0x58   : > { %1093 = vmatmul.mubr.f32.vlgmr.msra.gmra.mxu0 %v5127_v12  ;;  %1131 = vmatpush1.xpose.msra.mxu1 %v5104_v7  ;;  %v1441_v54 = vsub.f32 %v5270_v40, %v1440_v47  ;;  %v5313_v57 = vsub.f32 %v383_v41, %v5294_v48  ;;  %v1488_v58 = vand.u32 4294901760, %v5263_v37  ;;  %v1447_v12 = vsub.f32 %v5279_v43, %v1446_v11  ;;  %s5465_s26 = sld [smem:[#allocation7 + $0x182]] }
  0x59   : > { %1213 = vmatpush1.xpose.msra.mxu0 %v5144_v17  ;;  %1167 = vmatprep.mubr.f32.mxu1 %v5139_v16  ;;  %v382_v59 = vadd.f32 %v380_v4, %v370_v51  ;;  %v353_v60 = vadd.f32 %v351_v53, %v343_v50  ;;  %v1494_v63 = vand.u32 4294901760, %v5284_v44  ;;  %v362_v16 = vmul.f32 %v361_v55, %v5171_v31  ;;  %s5479_s7 = sld [smem:[#allocation6 + $0x182]] }
  0x5a   : > { %1247 = vmatprep.mubr.f32.mxu0 %v5098_v5  ;;  %1285 = vmatprep.subr.mxu1 %v5098_v5  ;;  %v1442_v62 = vand.u32 4294901760, %v1441_v54  ;;  %v363_v8 = vmul.f32 %v361_v55, %v5158_v23  ;;  %v374_v13 = vmul.f32 %v373_v56, %v5174_v32  ;;  %v375_v18 = vmul.f32 %v373_v56, %v5161_v24  ;;  %s5496_s15 = sld [smem:[#allocation7 + $0x183]] }
  0x5b   : > { %1171 = vmatmul.mubr.f32.vlgmr.msra.gmra.mxu1 %v5144_v17  ;;  %1403 = vmatprep.subr.mxu0 %v5218_v61  ;;  %v5332_v10 = vand.u32 4294901760, %v382_v59  ;;  %v1958_v19 = vand.u32 4294901760, %v5313_v57  ;;  %v1448_v20 = vand.u32 4294901760, %v1447_v12  ;;  %v352_v22 = vadd.f32 %v350_v52, %v342_v49  ;;  %s5507_s16 = sld [smem:[#allocation6 + $0x183]] }
  0x5c   : > { %1249 = vmatmul.mubr.f32.vlgmr.msra.gmra.mxu0 %v5104_v7  ;;  %1287 = vmatpush1.xpose.msra.mxu1 %v5104_v7  ;;  %v365_v21 = vadd.f32 %v363_v8, %v353_v60  ;;  %v2794_v17 = vstv %s5274_s18  ;;  %v5348_v26 = vand.u32 4294901760, %v5171_v31  ;;  %v2804_v30 = vstv %s5289_s23  ;;  %s4586_s18 = sshll.u32 %s5062_s29, 3 }
  0x5d   : > { %1405 = vmatpush1.xpose.msra.mxu0 %v5224_v9  ;;  %1321 = vmatprep.mubr.f32.mxu1 %v5098_v5  ;;  %v5345_v25 = vsub.f32 %v382_v59, %v5332_v10  ;;  %v2796_v28 = vmul.f32 %v2794_v17, %v5087_v2  ;;  %v364_v36 = vadd.f32 %v362_v16, %v352_v22  ;;  %v2816_v3 = vstv %s5298_s27  ;;  %s5665_s23 = scalar_lea.vmem [#allocation10], %s4586_s18  ;;  %s4588_s27 = sshll.u32 %s5062_s29, 2 }
  0x5e   : > { %1443 = vmatprep.mubr.f32.mxu0 %v1442_v62  ;;  %1489 = vmatprep.subr.mxu1 %v1488_v58  ;;  %v377_v34 = vadd.f32 %v375_v18, %v365_v21  ;;  %v5360_v5 = vsub.f32 %v5313_v57, %v1958_v19  ;;  %v2806_v33 = vmul.f32 %v2804_v30, %v5081_v0  ;;  %v2828_v42 = vstv %s5315_s30  ;;  %s5670_s30 = scalar_lea.vmem [#allocation12], %s4588_s27  ;;  %s4927_s27 = smov [#allocation10]  }
  0x5f   : > { %1323 = vmatmul.mubr.f32.vlgmr.msra.gmra.mxu1 %v5104_v7  ;;  %1568 = vmatprep.subr.mxu0 %v5231_v14  ;;  %v1964_v37 = vand.u32 4294901760, %v5345_v25  ;;  %v2818_v39 = vmul.f32 %v2816_v3, %v5158_v23  ;;  %v376_v4 = vadd.f32 %v374_v13, %v364_v36  ;;  %v5369_v7 = vsub.f32 %v5158_v23, %v5287_v46 }
  0x60   : > { %1449 = vmatmul.mubr.f32.vlgmr.msra.gmra.mxu0 %v1448_v20  ;;  %1495 = vmatpush1.xpose.msra.mxu1 %v1494_v63  ;;  %v5365_v41 = vand.u32 4294901760, %v377_v34  ;;  %v5378_v44 = vsub.f32 %v5171_v31, %v5348_v26  ;;  %v2808_v45 = vadd.f32 %v2806_v33, %v2796_v28  ;;  %v2830_v49 = vmul.f32 %v2828_v42, %v5161_v24 }
  0x61   : > { %1571 = vmatpush1.xpose.msra.mxu0 %v5243_v15  ;;  %1529 = vmatprep.mubr.f32.mxu1 %v5254_v29  ;;  %v2790_v50 = vstv %s5323_s6  ;;  %v5387_v52 = vand.u32 4294901760, %v376_v4  ;;  %v2795_v53 = vmul.f32 %v2794_v17, %v5101_v6  ;;  %v2805_v54 = vmul.f32 %v2804_v30, %v5084_v1  ;;  %s5674_s6 = scalar_lea.vmem [#allocation9], %s4586_s18 }
  0x62   : > { %1606 = vmatprep.mubr.f32.mxu0 %v5270_v40  ;;  %1645 = vmatprep.subr.mxu1 %v5218_v61  ;;  %v5385_v51 = vsub.f32 %v377_v34, %v5365_v41  ;;  %v1960_v55 = vand.u32 4294901760, %v5360_v5  ;;  %v1965_v56 = vsub.f32 %v5345_v25, %v1964_v37  ;;  %v2820_v58 = vadd.f32 %v2818_v39, %v2808_v45 }
  0x63   : > { %1531 = vmatmul.mubr.f32.vlgmr.msra.gmra.mxu1 %v5265_v38  ;;  %1725 = vmatprep.subr.mxu0 %v1486_v27  ;;  %v2817_v12 = vmul.f32 %v2816_v3, %v5171_v31  ;;  %v5405_v27 = vsub.f32 %v376_v4, %v5387_v52  ;;  %v2807_v59 = vadd.f32 %v2805_v54, %v2795_v53  ;;  %v2798_v16 = vstv %s5340_s10  ;;  %s4353_s10 = sand.u32 1, %s4991_s24  }
  0x64   : > { %1609 = vmatmul.mubr.f32.vlgmr.msra.gmra.mxu0 %v5279_v43  ;;  %1647 = vmatpush1.xpose.msra.mxu1 %v5224_v9  ;;  %v1912_v14 = vand.u32 4294901760, %v5385_v51  ;;  %v2829_v60 = vmul.f32 %v2828_v42, %v5174_v32  ;;  %v2791_v62 = vmul.f32 %v2790_v50, %v5101_v6  ;;  %v2792_v63 = vmul.f32 %v2790_v50, %v5087_v2 }
  0x65   : > { %1729 = vmatpush1.xpose.msra.mxu0 %v1492_v35  ;;  %1683 = vmatprep.mubr.f32.mxu1 %v1440_v47  ;;  %v2810_v8 = vstv %s5352_s11  ;;  %v1918_v35 = vand.u32 4294901760, %v5405_v27  ;;  %v2832_v40 = vadd.f32 %v2830_v49, %v2820_v58  ;;  %v2799_v47 = vmul.f32 %v2798_v16, %v5084_v1  ;;  %s4622_s11 = sshll.u32 %s4911_s21, 7 }
  0x66   : > { %1763 = vmatprep.mubr.f32.mxu0 %v5254_v29  ;;  %1801 = vmatprep.subr.mxu1 %v5218_v61  ;;  %v1913_v15 = vsub.f32 %v5385_v51, %v1912_v14  ;;  %v1966_v13 = vand.u32 4294901760, %v1965_v56  ;;  %v2819_v18 = vadd.f32 %v2817_v12, %v2807_v59  ;;  %v2800_v20 = vmul.f32 %v2798_v16, %v5081_v0 }
  0x67   : > { %1687 = vmatmul.mubr.f32.vlgmr.msra.gmra.mxu1 %v1446_v11  ;;  %1875 = vmatprep.subr.mxu0 %v5294_v48  ;;  %v2812_v61 = vmul.f32 %v2810_v8, %v5158_v23  ;;  %v1919_v22 = vsub.f32 %v5405_v27, %v1918_v35  ;;  %v2811_v43 = vmul.f32 %v2810_v8, %v5171_v31  ;;  %v2822_v11 = vstv %s5372_s12  ;;  %s4387_s12 = sshll.u32 %s5665_s23, 4  ;;  %s5742_s12 = int_to_ptr.vmem [resolvable:$true] %s4387_s12 }
  0x68   : > { %1765 = vmatmul.mubr.f32.vlgmr.msra.gmra.mxu0 %v5265_v38  ;;  %1803 = vmatpush1.xpose.msra.mxu1 %v5224_v9  ;;  %v1914_v21 = vand.u32 4294901760, %v1913_v15  ;;  %v5440_v17 = vand.u32 4294901760, %v5369_v7  ;;  %v2802_v28 = vadd.f32 %v2800_v20, %v2792_v63  ;;  %v2824_v30 = vmul.f32 %v2822_v11, %v5161_v24  ;;  %s4775_s18 = scalar_lea.vmem %s5742_s12, 128 }
  0x69   : > { %1877 = vmatpush1.xpose.msra.mxu0 %v5332_v10  ;;  %1837 = vmatprep.mubr.f32.mxu1 %v5254_v29  ;;  %v1920_v9 = vand.u32 4294901760, %v1919_v22  ;;  %v5444_v34 = vand.u32 4294901760, %v5378_v44  ;;  %v2823_v36 = vmul.f32 %v2822_v11, %v5174_v32  ;;  %v2801_v3 = vadd.f32 %v2799_v47, %v2791_v62  ;;  %p4776_p7 = scmp.ne.s32.totalorder %s5742_s12, %s4775_s18 }
  0x6a   : > { %1915 = vmatprep.mubr.f32.mxu0 %v1914_v21  ;;  %1961 = vmatprep.subr.mxu1 %v1960_v55  ;;  %v5449_v29 = vand.u32 4294901760, %v2832_v40  ;;  %v2831_v5 = vadd.f32 %v2829_v60, %v2819_v18  ;;  %v2814_v33 = vadd.f32 %v2812_v61, %v2802_v28  ;;  %v3784_v39 = vstv %s5399_s13  ;;  %s4624_s13 = sshll.u32 %s4911_s21, 6 }
  0x6b   : > { %1839 = vmatmul.mubr.f32.vlgmr.msra.gmra.mxu1 %v5265_v38  ;;  %2040 = vmatprep.subr.mxu0 %v5313_v57  ;;  %v2813_v4 = vadd.f32 %v2811_v43, %v2801_v3  ;;  %v3786_v42 = vmul.f32 %v3784_v39, %v5087_v2  ;;  %v3794_v45 = vstv %s5416_s14  ;;  %v2385_v49 = vsub.f32 %v5369_v7, %v5440_v17  ;;  %s4401_s14 = sshll.u32 %s5670_s30, 4  ;;  %p4777_p5 = pnand %p4776_p7, %p5010_p8  ;;  %s5749_s14 = int_to_ptr.vmem [resolvable:$true] %s4401_s14 }
  0x6c   : > { %1921 = vmatmul.mubr.f32.vlgmr.msra.gmra.mxu0 %v1920_v9  ;;  %1967 = vmatpush1.xpose.msra.mxu1 %v1966_v13  ;;  %v2826_v38 = vadd.f32 %v2824_v30, %v2814_v33  ;;  %v3796_v53 = vmul.f32 %v3794_v45, %v5081_v0  ;;  %v2391_v54 = vsub.f32 %v5378_v44, %v5444_v34  ;;  %v5472_v55 = vand.u32 4294901760, %v2831_v5 }
  0x6d   : > { %2043 = vmatpush1.xpose.msra.mxu0 %v5345_v25  ;;  %2001 = vmatprep.mubr.f32.mxu1 %v5365_v41  ;;  %v2825_v50 = vadd.f32 %v2823_v36, %v2813_v4  ;;  %v5477_v58 = vsub.f32 %v2832_v40, %v5449_v29  ;;  %v2386_v59 = vand.u32 4294901760, %v2385_v49  ;;  %v3785_v60 = vmul.f32 %v3784_v39, %v5101_v6  ;;  %p4778_p10 = pneg %p4777_p5 }
  0x6e   : > { %2078 = vmatprep.mubr.f32.mxu0 %v5385_v51  ;;  %2117 = vmatprep.subr.mxu1 %v5294_v48  ;;  %v5474_v56 = vand.u32 4294901760, %v2826_v38  ;;  %v5485_v57 = vadd.f32 %v3796_v53, %v3786_v42  ;;  %v3795_v25 = vmul.f32 %v3794_v45, %v5084_v1  ;;  %v5504_v51 = vsub.f32 %v2831_v5, %v5472_v55 }
  0x6f   : > { %2003 = vmatmul.mubr.f32.vlgmr.msra.gmra.mxu1 %v5387_v52  ;;  %2197 = vmatprep.subr.mxu0 %v1958_v19  ;;  %v5483_v12 = vand.u32 4294901760, %v2825_v50  ;;  %v3780_v62 = vstv %s5452_s17  ;;  %v3788_v63 = vstv %s5455_s25  ;;  %v3806_v8 = vstv %s5465_s26  ;;  %s5740_s25 = scalar_lea.hbm %s5851_s4, %s4622_s11 }
  0x70   : > { %2081 = vmatmul.mubr.f32.vlgmr.msra.gmra.mxu0 %v5405_v27  ;;  %2119 = vmatpush1.xpose.msra.mxu1 %v5332_v10  ;;  %v5492_v19 = vsub.f32 %v2826_v38, %v5474_v56  ;;  %v5514_v27 = vadd.f32 %v3795_v25, %v3785_v60  ;;  %v3781_v15 = vmul.f32 %v3780_v62, %v5101_v6  ;;  %v3800_v47 = vstv %s5479_s7 }
  0x71   : > { %2201 = vmatpush1.xpose.msra.mxu0 %v1964_v37  ;;  %2155 = vmatprep.mubr.f32.mxu1 %v1912_v14  ;;  %v2392_v37 = vand.u32 4294901760, %v2391_v54  ;;  %v5512_v14 = vsub.f32 %v2825_v50, %v5483_v12  ;;  %v3789_v40 = vmul.f32 %v3788_v63, %v5084_v1  ;;  %v3818_v18 = vstv %s5496_s15  ;;  %s5747_s15 = scalar_lea.hbm %s5852_s5, %s4624_s13 }
  0x72   : > { %2235 = vmatprep.mubr.f32.mxu0 %v5365_v41  ;;  %2273 = vmatprep.subr.mxu1 %v5294_v48  ;;  %v2947_v48 = vand.u32 4294901760, %v5477_v58  ;;  %v2901_v16 = vand.u32 4294901760, %v5492_v19  ;;  %v3802_v20 = vmul.f32 %v3800_v47, %v5158_v23  ;;  %v5549_v21 = vadd.f32 %v5158_v23, %v5171_v31 }
  0x73   : > { %2159 = vmatmul.mubr.f32.vlgmr.msra.gmra.mxu1 %v1918_v35  ;;  %2347 = vmatprep.subr.mxu0 %v5287_v46  ;;  %v2953_v35 = vand.u32 4294901760, %v5504_v51  ;;  %v3791_v61 = vadd.f32 %v3789_v40, %v3781_v15  ;;  %v3812_v43 = vstv %s5507_s16  ;;  %v5562_v11 = vadd.f32 %v5161_v24, %v5174_v32  ;;  %s5754_s16 = scalar_lea.sflag [#allocation11], %s4353_s10 }
  0x74   : > { %2237 = vmatmul.mubr.f32.vlgmr.msra.gmra.mxu0 %v5387_v52  ;;  %2275 = vmatpush1.xpose.msra.mxu1 %v5332_v10  ;;  %v3782_v10 = vmul.f32 %v3780_v62, %v5087_v2  ;;  %v2948_v6 = vsub.f32 %v5477_v58, %v2947_v48  ;;  %v2907_v2 = vand.u32 4294901760, %v5512_v14  ;;  %v2902_v1 = vsub.f32 %v5492_v19, %v2901_v16 }
  0x75   : > { %2349 = vmatpush1.xpose.msra.mxu0 %v5348_v26  ;;  %2309 = vmatprep.mubr.f32.mxu1 %v5365_v41  ;;  %v3790_v41 = vmul.f32 %v3788_v63, %v5081_v0  ;;  %v5540_v0 = vand.u32 4294901760, %v5161_v24  ;;  %v2954_v22 = vsub.f32 %v5504_v51, %v2953_v35  ;;  %v3807_v28 = vmul.f32 %v3806_v8, %v5171_v31 }
  0x76   : > { %2387 = vmatprep.mubr.f32.mxu0 %v2386_v59  ;;  %2433 = vmatprep.subr.mxu1 %v2386_v59  ;;  %v3801_v30 = vmul.f32 %v3800_v47, %v5171_v31  ;;  %v2949_v9 = vand.u32 4294901760, %v2948_v6  ;;  %v2903_v3 = vand.u32 4294901760, %v2902_v1  ;;  %v3814_v31 = vmul.f32 %v3812_v43, %v5161_v24 }
  0x77   : > { %2311 = vmatmul.mubr.f32.vlgmr.msra.gmra.mxu1 %v5387_v52  ;;  %2512 = vmatprep.subr.mxu0 %v5369_v7  ;;  %v3808_v52 = vmul.f32 %v3806_v8, %v5158_v23  ;;  %v3792_v13 = vadd.f32 %v3790_v41, %v3782_v10  ;;  %v2908_v23 = vsub.f32 %v5512_v14, %v2907_v2  ;;  %v4926_v40 = vmov 0.0  }
  0x78   : > { %2393 = vmatmul.mubr.f32.vlgmr.msra.gmra.mxu0 %v2392_v37  ;;  %2439 = vmatpush1.xpose.msra.mxu1 %v2392_v37  ;;  %v5575_v36 = vsub.f32 %v5161_v24, %v5540_v0  ;;  %v3819_v4 = vmul.f32 %v3818_v18, %v5174_v32  ;;  %v3809_v38 = vadd.f32 %v3807_v28, %v5514_v27 }
  0x79   : > { %2515 = vmatpush1.xpose.msra.mxu0 %v5378_v44  ;;  %2473 = vmatprep.mubr.f32.mxu1 %v5287_v46  ;;  %v3810_v5 = vadd.f32 %v3808_v52, %v5485_v57  ;;  %v3804_v33 = vadd.f32 %v3802_v20, %v3792_v13  ;;  %v2909_v42 = vand.u32 4294901760, %v2908_v23  ;;  %v3803_v45 = vadd.f32 %v3801_v30, %v3791_v61 }
  0x7a   : > { %2550 = vmatprep.mubr.f32.mxu0 %v5369_v7  ;;  %2589 = vmatprep.subr.mxu1 %v5287_v46  ;;  %v5557_v7 = vand.u32 4294901760, %v5174_v32  ;;  %329 = vst.msk [vmem:[%s5665_s23] sm:$0xff] %vm327_vm0, %v4926_v40  ;;  %328 = vst.msk [vmem:[%s5674_s6] sm:$0xff] %vm327_vm0, %v4926_v40 }
  0x7b   : > { %2475 = vmatmul.mubr.f32.vlgmr.msra.gmra.mxu1 %v5348_v26  ;;  %2669 = vmatprep.subr.mxu0 %v5440_v17  ;;  %v3816_v50 = vadd.f32 %v3814_v31, %v3804_v33  ;;  %331 = vst.msk [vmem:[%s5670_s30] sm:$0xf] %vm330_vm1, %v4926_v40 }
  0x7c   : > { %2553 = vmatmul.mubr.f32.vlgmr.msra.gmra.mxu0 %v5378_v44  ;;  %2591 = vmatpush1.xpose.msra.mxu1 %v5348_v26  ;;  %v3820_v44 = vmul.f32 %v3818_v18, %v5161_v24  ;;  %v5586_v39 = vsub.f32 %v5174_v32, %v5557_v7  ;;  %v3813_v24 = vmul.f32 %v3812_v43, %v5174_v32 }
  0x7d   : > { %2673 = vmatpush1.xpose.msra.mxu0 %v5444_v34  ;;  %2627 = vmatprep.mubr.f32.mxu1 %v5440_v17  ;;  %v2955_v17 = vand.u32 4294901760, %v2954_v22  ;;  %v3821_v32 = vadd.f32 %v3819_v4, %v3809_v38 }
  0x7e   : > { %2707 = vmatprep.mubr.f32.mxu0 %v5287_v46  ;;  %2745 = vmatprep.subr.mxu1 %v5287_v46  ;;  %v3822_v49 = vadd.f32 %v3820_v44, %v3810_v5  ;;  %v3380_v53 = vand.u32 4294901760, %v5586_v39  ;;  %v3815_v54 = vadd.f32 %v3813_v24, %v3803_v45  ;;  %v4320_v44 = vlaneseq }
  0x7f   : > { %2631 = vmatmul.mubr.f32.vlgmr.msra.gmra.mxu1 %v5444_v34  ;;  %2864 = vmatprep.subr.mxu0 %v5449_v29  ;;  %v3374_v34 = vand.u32 4294901760, %v5575_v36  ;;  %v5614_v60 = vand.u32 4294901760, %v3821_v32 }
  0x80   : > { %2709 = vmatmul.mubr.f32.vlgmr.msra.gmra.mxu0 %v5348_v26  ;;  %2747 = vmatpush1.xpose.msra.mxu1 %v5348_v26  ;;  %v5604_v57 = vand.u32 4294901760, %v3822_v49  ;;  %v3381_v59 = vsub.f32 %v5586_v39, %v3380_v53  ;;  %v5616_v25 = vand.u32 4294901760, %v3815_v54  ;;  %v4323_v4 = vshrl.u32 %v4320_v44, 7 }
  0x81   : > { %2866 = vmatpush1.xpose.msra.mxu0 %v5472_v55  ;;  %2781 = vmatprep.mubr.f32.mxu1 %v5287_v46  ;;  %v3375_v46 = vsub.f32 %v5575_v36, %v3374_v34 }
  0x82   : > { %2904 = vmatprep.mubr.f32.mxu0 %v2903_v3  ;;  %2950 = vmatprep.subr.mxu1 %v2949_v9  ;;  %v3896_v27 = vsub.f32 %v3815_v54, %v5616_v25 }
  0x83   : > { %2783 = vmatmul.mubr.f32.vlgmr.msra.gmra.mxu1 %v5348_v26  ;;  %3029 = vmatprep.subr.mxu0 %v5477_v58  ;;  %v5606_v26 = vand.u32 4294901760, %v3816_v50  ;;  %v3376_v58 = vand.u32 4294901760, %v3375_v46 }
  0x84   : > { %2910 = vmatmul.mubr.f32.vlgmr.msra.gmra.mxu0 %v2909_v42  ;;  %2956 = vmatpush1.xpose.msra.mxu1 %v2955_v17 }
  0x85   : > { %3032 = vmatpush1.xpose.msra.mxu0 %v5504_v51  ;;  %2990 = vmatprep.mubr.f32.mxu1 %v5474_v56  ;;  %v3890_v37 = vsub.f32 %v3816_v50, %v5606_v26  ;;  %v3942_v51 = vsub.f32 %v3821_v32, %v5614_v60 }
  0x86   : > { %3067 = vmatprep.mubr.f32.mxu0 %v5492_v19  ;;  %3106 = vmatprep.subr.mxu1 %v5449_v29  ;;  %v3382_v19 = vand.u32 4294901760, %v3381_v59 }
  0x87   : > { %2992 = vmatmul.mubr.f32.vlgmr.msra.gmra.mxu1 %v5483_v12  ;;  %3186 = vmatprep.subr.mxu0 %v2947_v48  ;;  %v3936_v48 = vsub.f32 %v3822_v49, %v5604_v57  ;;  %v3943_v62 = vand.u32 4294901760, %v3942_v51 }
  0x88   : > { %3070 = vmatmul.mubr.f32.vlgmr.msra.gmra.mxu0 %v5512_v14  ;;  %3108 = vmatpush1.xpose.msra.mxu1 %v5472_v55 }
  0x89   : > { %3190 = vmatpush1.xpose.msra.mxu0 %v2953_v35  ;;  %3144 = vmatprep.mubr.f32.mxu1 %v2901_v16  ;;  %v3937_v14 = vand.u32 4294901760, %v3936_v48  ;;  %v3944_v16 = vsub.f32 %v3942_v51, %v3943_v62 }
  0x8a   : > { %3224 = vmatprep.mubr.f32.mxu0 %v5474_v56  ;;  %3262 = vmatprep.subr.mxu1 %v5449_v29  ;;  %v3891_v29 = vand.u32 4294901760, %v3890_v37 }
  0x8b   : > { %3148 = vmatmul.mubr.f32.vlgmr.msra.gmra.mxu1 %v2907_v2  ;;  %3337 = vmatprep.subr.mxu0 %v5540_v0  ;;  %v3938_v63 = vsub.f32 %v3936_v48, %v3937_v14  ;;  %v3945_v35 = vand.u32 4294901760, %v3944_v16 }
  0x8c   : > { %3226 = vmatmul.mubr.f32.vlgmr.msra.gmra.mxu0 %v5483_v12  ;;  %3264 = vmatpush1.xpose.msra.mxu1 %v5472_v55  ;;  %v3897_v55 = vand.u32 4294901760, %v3896_v27 }
  0x8d   : > { %3339 = vmatpush1.xpose.msra.mxu0 %v5557_v7  ;;  %3298 = vmatprep.mubr.f32.mxu1 %v5474_v56  ;;  %v3892_v56 = vsub.f32 %v3890_v37, %v3891_v29  ;;  %v3939_v15 = vand.u32 4294901760, %v3938_v63 }
  0x8e   : > { %3377 = vmatprep.mubr.f32.mxu0 %v3376_v58  ;;  %3423 = vmatprep.subr.mxu1 %v3376_v58 }
  0x8f   : > { %3300 = vmatmul.mubr.f32.vlgmr.msra.gmra.mxu1 %v5483_v12  ;;  %3502 = vmatprep.subr.mxu0 %v5575_v36  ;;  %v3898_v12 = vsub.f32 %v3896_v27, %v3897_v55  ;;  %v3893_v8 = vand.u32 4294901760, %v3892_v56 }
  0x90   : > { %3383 = vmatmul.mubr.f32.vlgmr.msra.gmra.mxu0 %v3382_v19  ;;  %3429 = vmatpush1.xpose.msra.mxu1 %v3382_v19 }
  0x91   : > { %3505 = vmatpush1.xpose.msra.mxu0 %v5586_v39  ;;  %3463 = vmatprep.mubr.f32.mxu1 %v5540_v0  ;;  %v3899_v10 = vand.u32 4294901760, %v3898_v12 }
  0x92   : > { %3540 = vmatprep.mubr.f32.mxu0 %v5575_v36  ;;  %3579 = vmatprep.subr.mxu1 %v5540_v0 }
  0x93   : > { %3465 = vmatmul.mubr.f32.vlgmr.msra.gmra.mxu1 %v5557_v7  ;;  %3659 = vmatprep.subr.mxu0 %v3374_v34 }
  0x94   : > { %3543 = vmatmul.mubr.f32.vlgmr.msra.gmra.mxu0 %v5586_v39  ;;  %3581 = vmatpush1.xpose.msra.mxu1 %v5557_v7  ;;  %v4321_v39 = vand.u32 127, %v4320_v44 }
  0x95   : > { %3663 = vmatpush1.xpose.msra.mxu0 %v3380_v53  ;;  %3617 = vmatprep.mubr.f32.mxu1 %v3374_v34 }
  0x96   : > { %3697 = vmatprep.mubr.f32.mxu0 %v5540_v0  ;;  %3735 = vmatprep.subr.mxu1 %v5540_v0  ;;  %v4324_v34 = vsub.s32 %v4321_v39, %v4323_v4 }
  0x97   : > { %3621 = vmatmul.mubr.f32.vlgmr.msra.gmra.mxu1 %v3380_v53  ;;  %3854 = vmatprep.subr.mxu0 %v5604_v57 }
  0x98   : > { %3699 = vmatmul.mubr.f32.vlgmr.msra.gmra.mxu0 %v5557_v7  ;;  %3737 = vmatpush1.xpose.msra.mxu1 %v5557_v7 }
  0x99   : > { %3856 = vmatpush1.xpose.msra.mxu0 %v5614_v60  ;;  %3771 = vmatprep.mubr.f32.mxu1 %v5540_v0 }
  0x9a   : > { %3894 = vmatprep.mubr.f32.mxu0 %v3893_v8  ;;  %3940 = vmatprep.subr.mxu1 %v3939_v15 }
  0x9b   : > { %3773 = vmatmul.mubr.f32.vlgmr.msra.gmra.mxu1 %v5557_v7  ;;  %4019 = vmatprep.subr.mxu0 %v3936_v48 }
  0x9c   : > { %3900 = vmatmul.mubr.f32.vlgmr.msra.gmra.mxu0 %v3899_v10  ;;  %3946 = vmatpush1.xpose.msra.mxu1 %v3945_v35 }
  0x9d   : > { %4022 = vmatpush1.xpose.msra.mxu0 %v3942_v51  ;;  %3980 = vmatprep.mubr.f32.mxu1 %v5606_v26 }
  0x9e   : > { %4057 = vmatprep.mubr.f32.mxu0 %v3890_v37  ;;  %4096 = vmatprep.subr.mxu1 %v5604_v57 }
  0x9f   : > { %3982 = vmatmul.mubr.f32.vlgmr.msra.gmra.mxu1 %v5616_v25  ;;  %4176 = vmatprep.subr.mxu0 %v3937_v14 }
  0xa0   : > { %4060 = vmatmul.mubr.f32.vlgmr.msra.gmra.mxu0 %v3896_v27  ;;  %4098 = vmatpush1.xpose.msra.mxu1 %v5614_v60 }
  0xa1   : > { %4180 = vmatpush1.xpose.msra.mxu0 %v3943_v62  ;;  %4134 = vmatprep.mubr.f32.mxu1 %v3891_v29  ;;  %v4303_v62 = vld [vmem:[%s5670_s30] sm:$0xf] }
  0xa2   : > { %4214 = vmatprep.mubr.f32.mxu0 %v5606_v26  ;;  %4252 = vmatprep.subr.mxu1 %v5604_v57 }
  0xa3   : > { %4138 = vmatmul.mubr.f32.vlgmr.msra.gmra.mxu1 %v3897_v55  ;;  %4311 = vadd.xlane.f32.xlu1 %v5549_v21 }
  0xa4   : > { %4216 = vmatmul.mubr.f32.vlgmr.msra.gmra.mxu0 %v5616_v25  ;;  %4254 = vmatpush1.xpose.msra.mxu1 %v5614_v60 }
  0xa5   : > { %4288 = vmatprep.mubr.f32.mxu1 %v5606_v26 }
  0xa7   : > { %4290 = vmatmul.mubr.f32.vlgmr.msra.gmra.mxu1 %v5616_v25  ;;  %4314 = vadd.xlane.f32.xlu1 %v5562_v11 }
  0xc9   : > { %v4306_v31 = vpop.xlane.xlu0 %4305 }
  0xca   : > { %v4325_v46 = vrot.slane %v4306_v31, %v4324_v34 }
  0xcd   : > { %v4309_v50 = vpop.xlane.xlu0 %4308 }
  0xce   : > { %v4329_v57 = vrot.slane %v4309_v50, %v4324_v34 }
  0xd0   : > { %v4339_v48 = vsel %vm4338_vm2, %v4329_v57, %v4325_v46 }
 0x108   : > { %v462_v41 = vpop.f32.mrf.mxu0 }
 0x10a   : > { %v464_v47 = vpop.f32.mrf.mxu0 }
 0x10b   : > { %v544_v6 = vpop.f32.mrf.mxu1 }
 0x10c   : > { %v5678_v2 = vpop.f32.mrf.mxu0  ;;  %v545_v63 = vadd.f32 %v544_v6, %v462_v41 }
 0x10d   : > { %v546_v1 = vpop.f32.mrf.mxu1 }
 0x10e   : > { %v624_v0 = vpop.f32.mrf.mxu0  ;;  %v623_v40 = vadd.f32 %v5678_v2, %v545_v63 }
 0x10f   : > { %v5680_v52 = vpop.f32.mrf.mxu1 }
 0x110   : > { %v5682_v13 = vpop.f32.mrf.mxu0 }
 0x111   : > { %v702_v18 = vpop.f32.mrf.mxu1 }
 0x112   : > { %v780_v20 = vpop.f32.mrf.mxu0 }
 0x113   : > { %v5684_v61 = vpop.f32.mrf.mxu1  ;;  %v701_v20 = vadd.f32 %v5680_v52, %v623_v40 }
 0x114   : > { %v5686_v21 = vpop.f32.mrf.mxu0 }
 0x115   : > { %v854_v22 = vpop.f32.mrf.mxu1 }
 0x116   : > { %v936_v7 = vpop.f32.mrf.mxu0 }
 0x117   : > { %v5688_v43 = vpop.f32.mrf.mxu1 }
 0x118   : > { %v5690_v11 = vpop.f32.mrf.mxu0 }
 0x119   : > { %v1018_v23 = vpop.f32.mrf.mxu1 }
 0x11a   : > { %v1096_v28 = vpop.f32.mrf.mxu0  ;;  %v779_v23 = vadd.f32 %v5682_v13, %v701_v20 }
 0x11b   : > { %v5692_v30 = vpop.f32.mrf.mxu1 }
 0x11c   : > { %v5694_v9 = vpop.f32.mrf.mxu0  ;;  %v853_v31 = vadd.f32 %v5684_v61, %v779_v23 }
 0x11d   : > { %v1174_v36 = vpop.f32.mrf.mxu1 }
 0x11e   : > { %v1252_v3 = vpop.f32.mrf.mxu0  ;;  %v935_v52 = vadd.f32 %v5686_v21, %v853_v31 }
 0x11f   : > { %v5696_v5 = vpop.f32.mrf.mxu1 }
 0x120   : > { %v1450_v33 = vpop.f32.mrf.mxu0 }
 0x121   : > { %v1326_v17 = vpop.f32.mrf.mxu1 }
 0x122   : > { %v1452_v42 = vpop.f32.mrf.mxu0 }
 0x123   : > { %v1532_v38 = vpop.f32.mrf.mxu1 }
 0x124   : > { %v1610_v24 = vpop.f32.mrf.mxu0  ;;  %v1533_v28 = vadd.f32 %v1532_v38, %v1450_v33  ;;  %v1017_v33 = vadd.f32 %v5688_v43, %v935_v52 }
 0x125   : > { %v1534_v45 = vpop.f32.mrf.mxu1 }
 0x126   : > { %v1612_v49 = vpop.f32.mrf.mxu0  ;;  %v1611_v17 = vadd.f32 %v1610_v24, %v1533_v28 }
 0x127   : > { %v1688_v53 = vpop.f32.mrf.mxu1 }
 0x128   : > { %v1766_v32 = vpop.f32.mrf.mxu0 }
 0x129   : > { %v1690_v54 = vpop.f32.mrf.mxu1 }
 0x12a   : > { %v1768_v26 = vpop.f32.mrf.mxu0 }
 0x12b   : > { %v1840_v59 = vpop.f32.mrf.mxu1 }
 0x12c   : > { %v5698_v60 = vpop.f32.mrf.mxu0  ;;  %v4312_v25 = vpop.xlane.xlu1 %4311 }
 0x12d   : > { %v1842_v58 = vpop.f32.mrf.mxu1  ;;  %v4333_v37 = vrot.slane %v4312_v25, %v4324_v34 }
 0x12e   : > { %v1924_v19 = vpop.f32.mrf.mxu0  ;;  %v1095_v58 = vadd.f32 %v5690_v11, %v1017_v33 }
 0x12f   : > { %v5700_v51 = vpop.f32.mrf.mxu1  ;;  %v4341_v14 = vsel %vm4340_vm3, %v4333_v37, %v4339_v48 }
 0x130   : > { %v5702_v27 = vpop.f32.mrf.mxu0  ;;  %v4315_v29 = vpop.xlane.xlu1 %4314 }
 0x131   : > { %v2006_v55 = vpop.f32.mrf.mxu1  ;;  %v4337_v56 = vrot.slane %v4315_v29, %v4324_v34  ;;  %v1689_v34 = vadd.f32 %v1688_v53, %v1611_v17 }
 0x132   : > { %v2084_v12 = vpop.f32.mrf.mxu0 }
 0x133   : > { %v5705_v16 = vpop.f32.mrf.mxu1  ;;  %v4343_v8 = vsel %vm4342_vm4, %v4337_v56, %v4341_v14  ;;  %v1767_v38 = vadd.f32 %v1766_v32, %v1689_v34  ;;  %v1173_v14 = vadd.f32 %v5692_v30, %v1095_v58 }
 0x134   : > { %v5707_v15 = vpop.f32.mrf.mxu0  ;;  %v4345_v10 = vadd.f32 %v4343_v8, %v4303_v62 }
 0x135   : > { %v2162_v35 = vpop.f32.mrf.mxu1  ;;  %v1841_v37 = vadd.f32 %v1840_v59, %v1767_v38  ;;  %v1251_v11 = vadd.f32 %v5694_v9, %v1173_v14 }
 0x136   : > { %v2240_v47 = vpop.f32.mrf.mxu0  ;;  %4347 = vst.msk [vmem:[%s5670_s30] sm:$0xf] %vm330_vm1, %v4345_v10  ;;  %s4779_s30 = sshll.u32 %s4927_s27, 4  ;;  %s4780_s30 = int_to_ptr.vmem [resolvable:$false] %s4779_s30 }
 0x137   : > { %v5712_v1 = vpop.f32.mrf.mxu1  ;;  %v1923_v55 = vadd.f32 %v5698_v60, %v1841_v37  ;;  %v1325_v20 = vadd.f32 %v5696_v5, %v1251_v11  ;;  %s4781_s13 = scalar_lea.vmem %s4780_s30, 256  ;;  %p4782_p11 = scmp.lt.s32.totalorder %s5742_s12, %s4780_s30 }
 0x138   : > { %v2394_v0 = vpop.f32.mrf.mxu0  ;;  %p4783_p1 = scmp.lt.s32.totalorder %s4781_s13, %s4775_s18 }
 0x139   : > { %v2314_v18 = vpop.f32.mrf.mxu1  ;;  %v2005_v59 = vadd.f32 %v5700_v51, %v1923_v55 }
 0x13a   : > { %v2396_v41 = vpop.f32.mrf.mxu0  ;;  %p4784_p0 = por %p4783_p1, %p4782_p11 }
 0x13b   : > { %v2476_v6 = vpop.f32.mrf.mxu1  ;;  %v2083_v41 = vadd.f32 %v5702_v27, %v2005_v59 }
 0x13c   : > { %v2554_v22 = vpop.f32.mrf.mxu0  ;;  %v2477_v54 = vadd.f32 %v2476_v6, %v2394_v0  ;;  %p4785_p2 = pnand %p4784_p0, %p4778_p10 }
 0x13d   : > { %v2478_v7 = vpop.f32.mrf.mxu1 }
 0x13e   : > { %v2556_v36 = vpop.f32.mrf.mxu0  ;;  %v2555_v25 = vadd.f32 %v2554_v22, %v2477_v54 }
 0x13f   : > { %v2632_v44 = vpop.f32.mrf.mxu1  ;;  %v4300_v36 = vld [vmem:[%s5665_s23] sm:$0xff] }
 0x140   : > { %v2710_v3 = vpop.f32.mrf.mxu0  ;;  %v2633_v21 = vadd.f32 %v2632_v44, %v2555_v25 }
 0x141   : > { %v2634_v2 = vpop.f32.mrf.mxu1 }
 0x142   : > { %v2712_v39 = vpop.f32.mrf.mxu0  ;;  %v2711_v62 = vadd.f32 %v2710_v3, %v2633_v21  ;;  %v2161_v3 = vadd.f32 %v5705_v16, %v2083_v41 }
 0x143   : > { %v2784_v4 = vpop.f32.mrf.mxu1 }
 0x144   : > { %v2911_v42 = vpop.f32.mrf.mxu0  ;;  %v2785_v47 = vadd.f32 %v2784_v4, %v2711_v62 }
 0x145   : > { %v2786_v45 = vpop.f32.mrf.mxu1 }
 0x146   : > { %v2913_v49 = vpop.f32.mrf.mxu0  ;;  %v2788_v22 = vadd.f32 %v2785_v47, %v1325_v20 }
 0x147   : > { %v2993_v50 = vpop.f32.mrf.mxu1 }
 0x148   : > { %v3071_v46 = vpop.f32.mrf.mxu0  ;;  %v2994_v56 = vadd.f32 %v2993_v50, %v2911_v42  ;;  %v2239_v42 = vadd.f32 %v5707_v15, %v2161_v3 }
 0x149   : > { %v2995_v13 = vpop.f32.mrf.mxu1 }
 0x14a   : > { %v3073_v57 = vpop.f32.mrf.mxu0  ;;  %v3072_v30 = vadd.f32 %v3071_v46, %v2994_v56 }
 0x14b   : > { %v3149_v26 = vpop.f32.mrf.mxu1 }
 0x14c   : > { %v3227_v61 = vpop.f32.mrf.mxu0  ;;  %v3150_v7 = vadd.f32 %v3149_v26, %v3072_v30 }
 0x14d   : > { %v3151_v24 = vpop.f32.mrf.mxu1 }
 0x14e   : > { %v3229_v48 = vpop.f32.mrf.mxu0  ;;  %v3228_v31 = vadd.f32 %v3227_v61, %v3150_v7 }
 0x14f   : > { %v5720_v19 = vpop.f32.mrf.mxu1 }
 0x150   : > { %v3384_v53 = vpop.f32.mrf.mxu0 }
 0x151   : > { %v3303_v29 = vpop.f32.mrf.mxu1 }
 0x152   : > { %v3386_v43 = vpop.f32.mrf.mxu0 }
 0x153   : > { %v3466_v32 = vpop.f32.mrf.mxu1 }
 0x154   : > { %v3467_v63 = vadd.f32 %v3466_v32, %v3384_v53  ;;  %v3544_v12 = vpop.f32.mrf.mxu0 }
 0x155   : > { %v3468_v8 = vpop.f32.mrf.mxu1 }
 0x156   : > { %v3545_v10 = vadd.f32 %v3544_v12, %v3467_v63  ;;  %v3546_v35 = vpop.f32.mrf.mxu0 }
 0x157   : > { %v3622_v40 = vpop.f32.mrf.mxu1 }
 0x158   : > { %v3623_v60 = vadd.f32 %v3622_v40, %v3545_v10  ;;  %v3700_v0 = vpop.f32.mrf.mxu0 }
 0x159   : > { %v3624_v18 = vpop.f32.mrf.mxu1 }
 0x15a   : > { %v3701_v9 = vadd.f32 %v3700_v0, %v3623_v60  ;;  %v3702_v51 = vpop.f32.mrf.mxu0 }
 0x15b   : > { %v3774_v6 = vpop.f32.mrf.mxu1 }
 0x15c   : > { %v3775_v23 = vadd.f32 %v3774_v6, %v3701_v9  ;;  %v3901_v28 = vpop.f32.mrf.mxu0 }
 0x15d   : > { %v3776_v44 = vpop.f32.mrf.mxu1 }
 0x15e   : > { %v3778_v5 = vadd.f32 %v3775_v23, %v2788_v22  ;;  %v3903_v27 = vpop.f32.mrf.mxu0 }
 0x15f   : > { %v3983_v2 = vpop.f32.mrf.mxu1 }
 0x160   : > { %v4301_v17 = vadd.f32 %v4300_v36, %v3778_v5  ;;  %v3984_v39 = vadd.f32 %v3983_v2, %v3901_v28  ;;  %v4061_v4 = vpop.f32.mrf.mxu0 }
 0x161   : > { %v3985_v16 = vpop.f32.mrf.mxu1 }
 0x162   : > { %4302 = vst.msk [vmem:[%s5665_s23] sm:$0xff] %vm327_vm0, %v4301_v17  ;;  %v4062_v45 = vadd.f32 %v4061_v4, %v3984_v39  ;;  %v4063_v52 = vpop.f32.mrf.mxu0 }
 0x163   : > { %v4139_v34 = vpop.f32.mrf.mxu1 }
 0x164   : > { %4788 = shalt.err (!%p4785_p2)
}
 0x165   : > { %s4789_s23 = scalar_lea.hbm %s5740_s25, 128  ;;  %s4793_s24 = scalar_lea.hbm %s5851_s4, 256 }
 0x166   : > { %p4790_p6 = scmp.ne.s32.totalorder %s5740_s25, %s4789_s23  ;;  %p4794_p13 = scmp.lt.s32.totalorder %s5740_s25, %s5851_s4 }
 0x167   : > { %p4795_p4 = scmp.lt.s32.totalorder %s4793_s24, %s4789_s23 }
 0x168   : > { %p4791_p3 = pnand %p4790_p6, %p5010_p8 }
 0x169   : > { %p4796_p7 = por %p4795_p4, %p4794_p13 }
 0x16a   : > { %p4792_p12 = pneg %p4791_p3 }
 0x16c   : > { %p4797_p5 = pnand %p4796_p7, %p4792_p12 }
 0x16e   : > { %4800 = shalt.err (!%p4797_p5)
}
 0x16f   : > { %4640 = dma.vmem_to_hbm [thread:$0]  (%p5010_p8), %s5742_s12, 128, %s5740_s25, %s5754_s16   ;;  %v3302_v15 = vadd.f32 %v5720_v19, %v3228_v31  ;;  %v4140_v49 = vadd.f32 %v4139_v34, %v4062_v45  ;;  %v4217_v50 = vpop.f32.mrf.mxu0 }
 0x170   : > { %s4801_s18 = scalar_lea.vmem %s5749_s14, 64  ;;  %s4928_s27 = smov [#allocation12]  }
 0x171   : > { %p4802_p10 = scmp.ne.s32.totalorder %s5749_s14, %s4801_s18  ;;  %s4805_s30 = sshll.u32 %s4928_s27, 4  ;;  %s4806_s30 = int_to_ptr.vmem [resolvable:$false] %s4805_s30 }
 0x172   : > { %s4807_s13 = scalar_lea.vmem %s4806_s30, 128  ;;  %p4808_p0 = scmp.lt.s32.totalorder %s5749_s14, %s4806_s30 }
 0x173   : > { %p4803_p11 = pnand %p4802_p10, %p5010_p8  ;;  %p4809_p2 = scmp.lt.s32.totalorder %s4807_s13, %s4801_s18 }
 0x175   : > { %p4804_p1 = pneg %p4803_p11  ;;  %p4810_p6 = por %p4809_p2, %p4808_p0 }
 0x177   : > { %p4811_p3 = pnand %p4810_p6, %p4804_p1 }
 0x179   : > { %4814 = shalt.err (!%p4811_p3)
}
 0x17a   : > { %s4815_s12 = scalar_lea.hbm %s5747_s15, 64  ;;  %s4819_s10 = scalar_lea.hbm %s5852_s5, 128 }
 0x17b   : > { %p4816_p12 = scmp.ne.s32.totalorder %s5747_s15, %s4815_s12  ;;  %p4820_p7 = scmp.lt.s32.totalorder %s5747_s15, %s5852_s5 }
 0x17c   : > { %p4821_p5 = scmp.lt.s32.totalorder %s4819_s10, %s4815_s12 }
 0x17d   : > { %p4817_p13 = pnand %p4816_p12, %p5010_p8 }
 0x17e   : > { %p4822_p10 = por %p4821_p5, %p4820_p7 }
 0x17f   : > { %p4818_p4 = pneg %p4817_p13 }
 0x181   : > { %p4823_p11 = pnand %p4822_p10, %p4818_p4 }
 0x183   : > { %4826 = shalt.err (!%p4823_p11)
}
 0x184   : > { %4641 = dma.vmem_to_hbm [thread:$0]  (%p5010_p8), %s5749_s14, 64, %s5747_s15, %s5754_s16   ;;  %v4141_v54 = vpop.f32.mrf.mxu1  ;;  %v2313_v46 = vadd.f32 %v5712_v1, %v2239_v42  ;;  %v4218_v13 = vadd.f32 %v4217_v50, %v4140_v49  ;;  %v4219_v33 = vpop.f32.mrf.mxu0  ;;  %v4296_v25 = vld [vmem:[%s5674_s6] sm:$0xff] }
 0x185   : > { %s4373_s26 = sshll.u32 %s5674_s6, 4  ;;  %s4371_s14 = scalar_lea.hbm %s5850_s3, %s4622_s11  ;;  %s4374_s26 = int_to_ptr.vmem [resolvable:$true] %s4373_s26 }
 0x186   : > { %v4291_v38 = vpop.f32.mrf.mxu1  ;;  %v3305_v57 = vadd.f32 %v3302_v15, %v2313_v46  ;;  %s4349_s15 = scalar_lea.sflag [#allocation4], %s5062_s29  ;;  %s4827_s16 = scalar_lea.vmem %s4374_s26, 128 }
 0x187   : > { %v4292_v26 = vadd.f32 %v4291_v38, %v4218_v13  ;;  %p4828_p1 = scmp.ne.s32.totalorder %s4374_s26, %s4827_s16  ;;  %s4929_s27 = smov [#allocation9]  }
 0x188   : > { %v4293_v61 = vpop.f32.mrf.mxu1  ;;  %s4831_s30 = sshll.u32 %s4929_s27, 4  ;;  %s4832_s30 = int_to_ptr.vmem [resolvable:$false] %s4831_s30 }
 0x189   : > { %v4295_v24 = vadd.f32 %v4292_v26, %v3305_v57  ;;  %p4829_p0 = pnand %p4828_p1, %p5010_p8  ;;  %s4833_s13 = scalar_lea.vmem %s4832_s30, 256 }
 0x18a   : > { %p4834_p6 = scmp.lt.s32.totalorder %s4374_s26, %s4832_s30  ;;  %p4835_p3 = scmp.lt.s32.totalorder %s4833_s13, %s4827_s16 }
 0x18b   : > { %v4297_v58 = vadd.f32 %v4296_v25, %v4295_v24  ;;  %p4830_p2 = pneg %p4829_p0 }
 0x18c   : > { %p4836_p12 = por %p4835_p3, %p4834_p6 }
 0x18d   : > { %4299 = vst.msk [vmem:[%s5674_s6] sm:$0xff] %vm327_vm0, %v4297_v58 }
 0x18e   : > { %p4837_p13 = pnand %p4836_p12, %p4830_p2 }
 0x190   : > { %4840 = shalt.err (!%p4837_p13)
}
 0x191   : > { %s4841_s21 = scalar_lea.hbm %s4371_s14, 128  ;;  %s4845_s11 = scalar_lea.hbm %s5850_s3, 256 }
 0x192   : > { %p4842_p4 = scmp.ne.s32.totalorder %s4371_s14, %s4841_s21  ;;  %p4846_p10 = scmp.lt.s32.totalorder %s4371_s14, %s5850_s3 }
 0x193   : > { %p4847_p11 = scmp.lt.s32.totalorder %s4845_s11, %s4841_s21 }
 0x194   : > { %p4843_p7 = pnand %p4842_p4, %p5010_p8 }
 0x195   : > { %p4848_p1 = por %p4847_p11, %p4846_p10 }
 0x196   : > { %p4844_p5 = pneg %p4843_p7 }
 0x198   : > { %p4849_p0 = pnand %p4848_p1, %p4844_p5 }
 0x19a   : > { %4852 = shalt.err (!%p4849_p0)
}
 0x19b   : > { %4639 = dma.vmem_to_hbm [thread:$0]  (%p5010_p8), %s4374_s26, 128, %s4371_s14, %s4349_s15  }
 0x19c PF: > { %s5872_s23 = sld [smem:[#allocation18_spill]] }
 0x19d   : > { %s5874_s17 = sld [smem:[#allocation19_spill]] }
 0x1a2   : > { %s4413_s24 = sand.u32 1, %s5872_s23  }
 0x1a3   : > { %p5875_p2 = scmp.ge.s32.totalorder %s5874_s17, 2  ;;  %s4414_s7 = scalar_lea.sflag [#allocation4], %s4413_s24 }
 0x1a5   : > { %p4657_p6 = pnand %p5875_p2, %p5014_p9 }
 0x1a7   : > { %p4658_p3 = pneg %p4657_p6 }
 0x1a9   : > { %4890 = dma.done.wait (%p4658_p3), %s4414_s7, 128  }
 0x1aa   : > { %4892 = vsyncadd (%p4658_p3), %s4414_s7, 4294967168  ;;  %s5876_s18 = sadd.s32 4294967294, %s5874_s17  }
 0x1ab   : > { %s4422_s16 = sand.u32 1, %s5876_s18  }
 0x1ac   : > { %s4423_s27 = scalar_lea.sflag [#allocation11], %s4422_s16 }
 0x1ad   : > { %4894 = dma.done.wait (%p4658_p3), %s4423_s27, 192  }
 0x1ae   : > { %4896 = vsyncadd (%p4658_p3), %s4423_s27, 4294967104  ;;  %s27_s23 = sadd.s32 1, %s5874_s17   ;;  %s5877_s18 = smov %s4903_s19 }
 0x1af   : > { %p24_p8 = scmp.ge.s32.totalorder %s27_s23, 4   ;;  %s5878_s19 = smov %s4907_s20 }
 0x1b0   : > { %s5879_s20 = smov %s5053_s9  ;;  %s5880_s21 = smov %s4915_s22 }
 0x1b1   : > { %s5881_s22 = smov %s5883_s8  ;;  %26 = sbr.rel (!%p24_p8) target bundleno = 10 (0xa), region = 122 }
 0x1b6   :  { %4437 = vsyncpa [#allocation3], 1 }
 0x1b7   :  { %4439 = vsyncpa [#allocation3 + $0x1], 1 }
 0x1b8   :  { %4440 = vsyncpa [#allocation4], 1 }
 0x1b9   :  { %4442 = vsyncpa [#allocation4 + $0x1], 1 }
 0x1ba   :  { %4443 = vsyncpa [#allocation11], 1 }
 0x1bb   :  { %4445 = vsyncpa [#allocation11 + $0x1], 1 }
 0x1bc   :  { %4446 = vsyncpa [#allocation5], 1 }
 0x1bd   :  { %4448 = vsyncpa [#allocation5 + $0x1], 1 }
 0x1be   :  { %4449 = vsyncpa [#allocation8], 1 }

</bundles_post_ra>
